<compile_context>
chip_gen: v7x
topology: tpu7x:2x2x1
jax: 0.10.0
libtpu: 0.0.40
codegen_flags: <defaults>
</compile_context>

<pallas_src>
import jax
import jax.numpy as jnp
from jax import lax
from jax.experimental import pallas as pl
from jax.experimental.pallas import tpu as pltpu


# ---- packed-parameter layout (weights stored (in, out) row-major, then bias) ----
OFF_E1_W, OFF_E1_B = 0, 24      # Encoder.linear1: 6 -> 4
OFF_E2_W, OFF_E2_B = 28, 36     # Encoder.linear2: 4 -> 2   (mu)
OFF_E3_W, OFF_E3_B = 38, 46     # Encoder.linear3: 4 -> 2   (log sigma)
OFF_D1_W, OFF_D1_B = 48, 72     # Decoder.linear1: 4 -> 6
OFF_D2_W, OFF_D2_B = 78, 102    # Decoder.linear2: 6 -> 4
N_PARAMS = 106


def autoencoder_kernel(p_ref, n_ref, inp_ref, out_ref, elbo_ref):
    # p_ref   : (106,)        packed weights/biases in SMEM (scalar reads)
    # n_ref   : (1,) int32    true (unpadded) batch size, SMEM
    # inp_ref : (8, R, 128)   rows 0-3 = x, 4-5 = y, 6-7 = eps   (dense tiles)
    # out_ref : (4, R, 128)   decoder output
    # elbo_ref: (1, 128)      masked, sublane-reduced elbo partial for this block
    R = inp_ref.shape[1]
    blk = R * 128

    rows_in = [inp_ref[k, :, :] for k in range(8)]   # 8 dense (R, 128) tiles
    x, y, eps = rows_in[0:4], rows_in[4:6], rows_in[6:8]

    def linear(rows, in_dim, out_dim, w_off, b_off):
        # Unrolled scalar-broadcast FMAs: out[j] = sum_k W[k, j] * rows[k] + b[j]
        outs = []
        for j in range(out_dim):
            acc = rows[0] * p_ref[w_off + j]
            for k in range(1, in_dim):
                acc = acc + rows[k] * p_ref[w_off + k * out_dim + j]
            outs.append(acc + p_ref[b_off + j])
        return outs                                   # list of (R, 128)

    # ---- Encoder ----
    h = [jnp.maximum(r, 0.0) for r in linear(x + y, 6, 4, OFF_E1_W, OFF_E1_B)]
    mu = linear(h, 4, 2, OFF_E2_W, OFF_E2_B)
    s = linear(h, 4, 2, OFF_E3_W, OFF_E3_B)           # pre-exp logits = log(sigma)
    sigma = [jnp.exp(si) for si in s]
    z = [mu[i] + sigma[i] * eps[i] for i in range(2)]

    # elbo contribution (summed over the 2 latent dims); log(sigma) is the
    # pre-exp logits s (exact and numerically safer). Padded lanes are masked
    # (zero-padded inputs still give nonzero elbo via the relu(bias) path),
    # then the block is reduced over the sublane axis in-kernel.
    contrib = ((sigma[0] * sigma[0] + mu[0] * mu[0] - s[0] - 0.5)
               + (sigma[1] * sigma[1] + mu[1] * mu[1] - s[1] - 0.5))
    gidx = (pl.program_id(0) * blk
            + lax.broadcasted_iota(jnp.int32, (R, 128), 0) * 128
            + lax.broadcasted_iota(jnp.int32, (R, 128), 1))
    contrib = jnp.where(gidx < n_ref[0], contrib, 0.0)
    elbo_ref[...] = jnp.sum(contrib, axis=0, keepdims=True)   # (1, 128)

    # ---- Decoder ----  input is cat([z, y]) = [z0, z1, y0, y1]
    zy = [z[0], z[1], y[0], y[1]]
    h2 = [jnp.maximum(r, 0.0) for r in linear(zy, 4, 6, OFF_D1_W, OFF_D1_B)]
    o = linear(h2, 6, 4, OFF_D2_W, OFF_D2_B)
    for j in range(4):
        out_ref[j, :, :] = jax.nn.sigmoid(o[j])       # 4 full dense tile stores


def autoencoder_forward(x, y, eps, params, blk=2048, core_parallel=False):
    """x:(B,4), y:(B,2), eps:(B,2), params = 10 weight/bias arrays.

    blk = batch elements (lanes) per grid step; must be a multiple of 1024
    (R = blk//128 sublane rows, kept at 8-16 so the unrolled body never spills).
    Set core_parallel=True on v7x to shard the batch grid across both TensorCores.

    Returns (out:(B,4), elbo: scalar)."""
    B = x.shape[0]
    assert blk % 1024 == 0, "blk must be a multiple of 1024 (R multiple of 8)"
    R = blk // 128

    # One flat parameter buffer -> a single tiny SMEM transfer.
    flat = jnp.concatenate([p.reshape(-1) for p in params]).astype(jnp.float32)
    assert flat.shape[0] == N_PARAMS
    n_true = jnp.array([B], dtype=jnp.int32)

    b_pad = ((B + blk - 1) // blk) * blk
    nblk = b_pad // blk

    # Fused feature-major input: rows 0-3 x, 4-5 y, 6-7 eps -> one DMA stream.
    # TODO(synk): the transpose here and on the output are extra HBM passes; a
    # producer/consumer that already works in feature-major (F, B) layout can
    # feed/read the (F, B_pad//128, 128) form directly and skip them.
    # TODO(synk): eps could be generated on-chip with pltpu.prng_seed +
    # pltpu.stateful_normal (saves ~15% HBM traffic) but breaks bit-exact
    # comparison against the explicit-eps reference, so it stays an input here.
    inp = jnp.concatenate([x, y, eps], axis=1).T.astype(jnp.float32)   # (8, B)
    if b_pad != B:
        inp = jnp.pad(inp, ((0, 0), (0, b_pad - B)))
    inp = inp.reshape(8, b_pad // 128, 128)            # sublane+lane dense tiles

    sem = (pltpu.CORE_PARALLEL,) if core_parallel else (pltpu.PARALLEL,)

    out_t, elbo_rows = pl.pallas_call(
        autoencoder_kernel,
        out_shape=(jax.ShapeDtypeStruct((4, b_pad // 128, 128), jnp.float32),
                   jax.ShapeDtypeStruct((1, nblk * 128), jnp.float32)),
        grid=(nblk,),
        in_specs=[
            pl.BlockSpec(memory_space=pltpu.MemorySpace.SMEM),   # packed params
            pl.BlockSpec(memory_space=pltpu.MemorySpace.SMEM),   # true batch size
            pl.BlockSpec((8, R, 128), lambda i: (0, i, 0)),      # [x;y;eps]
        ],
        out_specs=(
            pl.BlockSpec((4, R, 128), lambda i: (0, i, 0)),      # out
            pl.BlockSpec((1, 128), lambda i: (0, i)),            # elbo partials
        ),
        compiler_params=pltpu.CompilerParams(dimension_semantics=sem),
    )(flat, n_true, inp)

    out = out_t.reshape(4, b_pad)[:, :B].T             # back to (B, 4)
    elbo = jnp.sum(elbo_rows)                          # tiny (nblk*128,) reduce
    return out, elbo


def reference_forward(x, y, eps, params):
    we1, be1, we2, be2, we3, be3, wd1, bd1, wd2, bd2 = params
    xy = jnp.concatenate([x, y], axis=1)
    h = jax.nn.relu(xy @ we1 + be1)
    mu = h @ we2 + be2
    sigma = jnp.exp(h @ we3 + be3)
    z = mu + sigma * eps
    elbo = jnp.sum(sigma ** 2 + mu ** 2 - jnp.log(sigma) - 0.5)
    zy = jnp.concatenate([z, y], axis=1)
    h2 = jax.nn.relu(zy @ wd1 + bd1)
    return jax.nn.sigmoid(h2 @ wd2 + bd2), elbo


def _linear_params(kw, kb, fan_in, fan_out):
    # Deterministic init matching nn.Linear's U(-1/sqrt(fan_in), 1/sqrt(fan_in)).
    bound = 1.0 / (fan_in ** 0.5)
    w = jax.random.uniform(kw, (fan_in, fan_out), jnp.float32, -bound, bound)
    b = jax.random.uniform(kb, (1, fan_out), jnp.float32, -bound, bound)
    return w, b


if __name__ == "__main__":
    key = jax.random.PRNGKey(0)
    keys = jax.random.split(key, 13)
    B = 5000   # not a multiple of 2048 -> exercises padding + a 3-step grid

    we1, be1 = _linear_params(keys[0], keys[1], 6, 4)   # Encoder.linear1
    we2, be2 = _linear_params(keys[2], keys[3], 4, 2)   # Encoder.linear2 (mu)
    we3, be3 = _linear_params(keys[4], keys[5], 4, 2)   # Encoder.linear3 (log sigma)
    wd1, bd1 = _linear_params(keys[6], keys[7], 4, 6)   # Decoder.linear1
    wd2, bd2 = _linear_params(keys[8], keys[9], 6, 4)   # Decoder.linear2
    params = (we1, be1, we2, be2, we3, be3, wd1, bd1, wd2, bd2)

    x = jax.random.normal(keys[10], (B, 4), jnp.float32)
    y = jax.random.normal(keys[11], (B, 2), jnp.float32)
    # TODO(synk): torch.distributions.Normal(0,1).sample is stateful RNG; noise is
    # supplied as an explicit deterministic eps input instead.
    eps = jax.random.normal(keys[12], (B, 2), jnp.float32)

    out, elbo = autoencoder_forward(x, y, eps, params, blk=2048)
    jax.block_until_ready((out, elbo))

    ref_out, ref_elbo = reference_forward(x, y, eps, params)
    assert out.shape == (B, 4) and elbo.shape == ()
    assert jnp.allclose(out, ref_out, rtol=1e-5, atol=1e-5)
    assert jnp.allclose(elbo, ref_elbo, rtol=1e-4, atol=1e-3)

    print("KERNEL_OK")
</pallas_src>

<mosaic_0001>
module attributes {stable_mosaic.version = 11 : i64} {
  func.func @autoencoder_kernel(%arg0: i32, %arg1: memref<106xf32, #tpu.memory_space<smem>>, %arg2: memref<1xi32, #tpu.memory_space<smem>>, %arg3: memref<8x16x128xf32, #tpu.memory_space<vmem>>, %arg4: memref<4x16x128xf32, #tpu.memory_space<vmem>>, %arg5: memref<1x128xf32, #tpu.memory_space<vmem>>) attributes {dimension_semantics = [#tpu.dimension_semantics<parallel>], iteration_bounds = array<i64: 3>, scalar_prefetch = 0 : i64, scratch_operands = 0 : i64, tpu.core_type = #tpu.core_type<tc>, window_params = [{transform_indices = @transform_0, window_bounds = array<i64: 106>}, {transform_indices = @transform_1, window_bounds = array<i64: 1>}, {transform_indices = @transform_2, window_bounds = array<i64: 8, 16, 128>}, {transform_indices = @transform_3, window_bounds = array<i64: 4, 16, 128>}, {transform_indices = @transform_4, window_bounds = array<i64: 1, 128>}]} {
    %c0 = arith.constant 0 : index
    %c0_0 = arith.constant 0 : index
    %c0_1 = arith.constant 0 : index
    %0 = vector.load %arg3[%c0, %c0_0, %c0_1] : memref<8x16x128xf32, #tpu.memory_space<vmem>>, vector<1x16x128xf32>
    %1 = vector.shape_cast %0 : vector<1x16x128xf32> to vector<16x128xf32>
    %c1 = arith.constant 1 : index
    %c0_2 = arith.constant 0 : index
    %c0_3 = arith.constant 0 : index
    %2 = vector.load %arg3[%c1, %c0_2, %c0_3] : memref<8x16x128xf32, #tpu.memory_space<vmem>>, vector<1x16x128xf32>
    %3 = vector.shape_cast %2 : vector<1x16x128xf32> to vector<16x128xf32>
    %c2 = arith.constant 2 : index
    %c0_4 = arith.constant 0 : index
    %c0_5 = arith.constant 0 : index
    %4 = vector.load %arg3[%c2, %c0_4, %c0_5] : memref<8x16x128xf32, #tpu.memory_space<vmem>>, vector<1x16x128xf32>
    %5 = vector.shape_cast %4 : vector<1x16x128xf32> to vector<16x128xf32>
    %c3 = arith.constant 3 : index
    %c0_6 = arith.constant 0 : index
    %c0_7 = arith.constant 0 : index
    %6 = vector.load %arg3[%c3, %c0_6, %c0_7] : memref<8x16x128xf32, #tpu.memory_space<vmem>>, vector<1x16x128xf32>
    %7 = vector.shape_cast %6 : vector<1x16x128xf32> to vector<16x128xf32>
    %c4 = arith.constant 4 : index
    %c0_8 = arith.constant 0 : index
    %c0_9 = arith.constant 0 : index
    %8 = vector.load %arg3[%c4, %c0_8, %c0_9] : memref<8x16x128xf32, #tpu.memory_space<vmem>>, vector<1x16x128xf32>
    %9 = vector.shape_cast %8 : vector<1x16x128xf32> to vector<16x128xf32>
    %c5 = arith.constant 5 : index
    %c0_10 = arith.constant 0 : index
    %c0_11 = arith.constant 0 : index
    %10 = vector.load %arg3[%c5, %c0_10, %c0_11] : memref<8x16x128xf32, #tpu.memory_space<vmem>>, vector<1x16x128xf32>
    %11 = vector.shape_cast %10 : vector<1x16x128xf32> to vector<16x128xf32>
    %c6 = arith.constant 6 : index
    %c0_12 = arith.constant 0 : index
    %c0_13 = arith.constant 0 : index
    %12 = vector.load %arg3[%c6, %c0_12, %c0_13] : memref<8x16x128xf32, #tpu.memory_space<vmem>>, vector<1x16x128xf32>
    %13 = vector.shape_cast %12 : vector<1x16x128xf32> to vector<16x128xf32>
    %c7 = arith.constant 7 : index
    %c0_14 = arith.constant 0 : index
    %c0_15 = arith.constant 0 : index
    %14 = vector.load %arg3[%c7, %c0_14, %c0_15] : memref<8x16x128xf32, #tpu.memory_space<vmem>>, vector<1x16x128xf32>
    %15 = vector.shape_cast %14 : vector<1x16x128xf32> to vector<16x128xf32>
    %c0_16 = arith.constant 0 : index
    %16 = memref.load %arg1[%c0_16] : memref<106xf32, #tpu.memory_space<smem>>
    %17 = vector.broadcast %16 : f32 to vector<16x128xf32>
    %18 = arith.mulf %1, %17 : vector<16x128xf32>
    %c4_17 = arith.constant 4 : index
    %19 = memref.load %arg1[%c4_17] : memref<106xf32, #tpu.memory_space<smem>>
    %20 = vector.broadcast %19 : f32 to vector<16x128xf32>
    %21 = arith.mulf %3, %20 : vector<16x128xf32>
    %22 = arith.addf %18, %21 : vector<16x128xf32>
    %c8 = arith.constant 8 : index
    %23 = memref.load %arg1[%c8] : memref<106xf32, #tpu.memory_space<smem>>
    %24 = vector.broadcast %23 : f32 to vector<16x128xf32>
    %25 = arith.mulf %5, %24 : vector<16x128xf32>
    %26 = arith.addf %22, %25 : vector<16x128xf32>
    %c12 = arith.constant 12 : index
    %27 = memref.load %arg1[%c12] : memref<106xf32, #tpu.memory_space<smem>>
    %28 = vector.broadcast %27 : f32 to vector<16x128xf32>
    %29 = arith.mulf %7, %28 : vector<16x128xf32>
    %30 = arith.addf %26, %29 : vector<16x128xf32>
    %c16 = arith.constant 16 : index
    %31 = memref.load %arg1[%c16] : memref<106xf32, #tpu.memory_space<smem>>
    %32 = vector.broadcast %31 : f32 to vector<16x128xf32>
    %33 = arith.mulf %9, %32 : vector<16x128xf32>
    %34 = arith.addf %30, %33 : vector<16x128xf32>
    %c20 = arith.constant 20 : index
    %35 = memref.load %arg1[%c20] : memref<106xf32, #tpu.memory_space<smem>>
    %36 = vector.broadcast %35 : f32 to vector<16x128xf32>
    %37 = arith.mulf %11, %36 : vector<16x128xf32>
    %38 = arith.addf %34, %37 : vector<16x128xf32>
    %c24 = arith.constant 24 : index
    %39 = memref.load %arg1[%c24] : memref<106xf32, #tpu.memory_space<smem>>
    %40 = vector.broadcast %39 : f32 to vector<16x128xf32>
    %41 = arith.addf %38, %40 : vector<16x128xf32>
    %c1_18 = arith.constant 1 : index
    %42 = memref.load %arg1[%c1_18] : memref<106xf32, #tpu.memory_space<smem>>
    %43 = vector.broadcast %42 : f32 to vector<16x128xf32>
    %44 = arith.mulf %1, %43 : vector<16x128xf32>
    %c5_19 = arith.constant 5 : index
    %45 = memref.load %arg1[%c5_19] : memref<106xf32, #tpu.memory_space<smem>>
    %46 = vector.broadcast %45 : f32 to vector<16x128xf32>
    %47 = arith.mulf %3, %46 : vector<16x128xf32>
    %48 = arith.addf %44, %47 : vector<16x128xf32>
    %c9 = arith.constant 9 : index
    %49 = memref.load %arg1[%c9] : memref<106xf32, #tpu.memory_space<smem>>
    %50 = vector.broadcast %49 : f32 to vector<16x128xf32>
    %51 = arith.mulf %5, %50 : vector<16x128xf32>
    %52 = arith.addf %48, %51 : vector<16x128xf32>
    %c13 = arith.constant 13 : index
    %53 = memref.load %arg1[%c13] : memref<106xf32, #tpu.memory_space<smem>>
    %54 = vector.broadcast %53 : f32 to vector<16x128xf32>
    %55 = arith.mulf %7, %54 : vector<16x128xf32>
    %56 = arith.addf %52, %55 : vector<16x128xf32>
    %c17 = arith.constant 17 : index
    %57 = memref.load %arg1[%c17] : memref<106xf32, #tpu.memory_space<smem>>
    %58 = vector.broadcast %57 : f32 to vector<16x128xf32>
    %59 = arith.mulf %9, %58 : vector<16x128xf32>
    %60 = arith.addf %56, %59 : vector<16x128xf32>
    %c21 = arith.constant 21 : index
    %61 = memref.load %arg1[%c21] : memref<106xf32, #tpu.memory_space<smem>>
    %62 = vector.broadcast %61 : f32 to vector<16x128xf32>
    %63 = arith.mulf %11, %62 : vector<16x128xf32>
    %64 = arith.addf %60, %63 : vector<16x128xf32>
    %c25 = arith.constant 25 : index
    %65 = memref.load %arg1[%c25] : memref<106xf32, #tpu.memory_space<smem>>
    %66 = vector.broadcast %65 : f32 to vector<16x128xf32>
    %67 = arith.addf %64, %66 : vector<16x128xf32>
    %c2_20 = arith.constant 2 : index
    %68 = memref.load %arg1[%c2_20] : memref<106xf32, #tpu.memory_space<smem>>
    %69 = vector.broadcast %68 : f32 to vector<16x128xf32>
    %70 = arith.mulf %1, %69 : vector<16x128xf32>
    %c6_21 = arith.constant 6 : index
    %71 = memref.load %arg1[%c6_21] : memref<106xf32, #tpu.memory_space<smem>>
    %72 = vector.broadcast %71 : f32 to vector<16x128xf32>
    %73 = arith.mulf %3, %72 : vector<16x128xf32>
    %74 = arith.addf %70, %73 : vector<16x128xf32>
    %c10 = arith.constant 10 : index
    %75 = memref.load %arg1[%c10] : memref<106xf32, #tpu.memory_space<smem>>
    %76 = vector.broadcast %75 : f32 to vector<16x128xf32>
    %77 = arith.mulf %5, %76 : vector<16x128xf32>
    %78 = arith.addf %74, %77 : vector<16x128xf32>
    %c14 = arith.constant 14 : index
    %79 = memref.load %arg1[%c14] : memref<106xf32, #tpu.memory_space<smem>>
    %80 = vector.broadcast %79 : f32 to vector<16x128xf32>
    %81 = arith.mulf %7, %80 : vector<16x128xf32>
    %82 = arith.addf %78, %81 : vector<16x128xf32>
    %c18 = arith.constant 18 : index
    %83 = memref.load %arg1[%c18] : memref<106xf32, #tpu.memory_space<smem>>
    %84 = vector.broadcast %83 : f32 to vector<16x128xf32>
    %85 = arith.mulf %9, %84 : vector<16x128xf32>
    %86 = arith.addf %82, %85 : vector<16x128xf32>
    %c22 = arith.constant 22 : index
    %87 = memref.load %arg1[%c22] : memref<106xf32, #tpu.memory_space<smem>>
    %88 = vector.broadcast %87 : f32 to vector<16x128xf32>
    %89 = arith.mulf %11, %88 : vector<16x128xf32>
    %90 = arith.addf %86, %89 : vector<16x128xf32>
    %c26 = arith.constant 26 : index
    %91 = memref.load %arg1[%c26] : memref<106xf32, #tpu.memory_space<smem>>
    %92 = vector.broadcast %91 : f32 to vector<16x128xf32>
    %93 = arith.addf %90, %92 : vector<16x128xf32>
    %c3_22 = arith.constant 3 : index
    %94 = memref.load %arg1[%c3_22] : memref<106xf32, #tpu.memory_space<smem>>
    %95 = vector.broadcast %94 : f32 to vector<16x128xf32>
    %96 = arith.mulf %1, %95 : vector<16x128xf32>
    %c7_23 = arith.constant 7 : index
    %97 = memref.load %arg1[%c7_23] : memref<106xf32, #tpu.memory_space<smem>>
    %98 = vector.broadcast %97 : f32 to vector<16x128xf32>
    %99 = arith.mulf %3, %98 : vector<16x128xf32>
    %100 = arith.addf %96, %99 : vector<16x128xf32>
    %c11 = arith.constant 11 : index
    %101 = memref.load %arg1[%c11] : memref<106xf32, #tpu.memory_space<smem>>
    %102 = vector.broadcast %101 : f32 to vector<16x128xf32>
    %103 = arith.mulf %5, %102 : vector<16x128xf32>
    %104 = arith.addf %100, %103 : vector<16x128xf32>
    %c15 = arith.constant 15 : index
    %105 = memref.load %arg1[%c15] : memref<106xf32, #tpu.memory_space<smem>>
    %106 = vector.broadcast %105 : f32 to vector<16x128xf32>
    %107 = arith.mulf %7, %106 : vector<16x128xf32>
    %108 = arith.addf %104, %107 : vector<16x128xf32>
    %c19 = arith.constant 19 : index
    %109 = memref.load %arg1[%c19] : memref<106xf32, #tpu.memory_space<smem>>
    %110 = vector.broadcast %109 : f32 to vector<16x128xf32>
    %111 = arith.mulf %9, %110 : vector<16x128xf32>
    %112 = arith.addf %108, %111 : vector<16x128xf32>
    %c23 = arith.constant 23 : index
    %113 = memref.load %arg1[%c23] : memref<106xf32, #tpu.memory_space<smem>>
    %114 = vector.broadcast %113 : f32 to vector<16x128xf32>
    %115 = arith.mulf %11, %114 : vector<16x128xf32>
    %116 = arith.addf %112, %115 : vector<16x128xf32>
    %c27 = arith.constant 27 : index
    %117 = memref.load %arg1[%c27] : memref<106xf32, #tpu.memory_space<smem>>
    %118 = vector.broadcast %117 : f32 to vector<16x128xf32>
    %119 = arith.addf %116, %118 : vector<16x128xf32>
    %cst = arith.constant 0.000000e+00 : f32
    %120 = vector.broadcast %cst : f32 to vector<16x128xf32>
    %121 = arith.maximumf %41, %120 : vector<16x128xf32>
    %cst_24 = arith.constant 0.000000e+00 : f32
    %122 = vector.broadcast %cst_24 : f32 to vector<16x128xf32>
    %123 = arith.maximumf %67, %122 : vector<16x128xf32>
    %cst_25 = arith.constant 0.000000e+00 : f32
    %124 = vector.broadcast %cst_25 : f32 to vector<16x128xf32>
    %125 = arith.maximumf %93, %124 : vector<16x128xf32>
    %cst_26 = arith.constant 0.000000e+00 : f32
    %126 = vector.broadcast %cst_26 : f32 to vector<16x128xf32>
    %127 = arith.maximumf %119, %126 : vector<16x128xf32>
    %c28 = arith.constant 28 : index
    %128 = memref.load %arg1[%c28] : memref<106xf32, #tpu.memory_space<smem>>
    %129 = vector.broadcast %128 : f32 to vector<16x128xf32>
    %130 = arith.mulf %121, %129 : vector<16x128xf32>
    %c30 = arith.constant 30 : index
    %131 = memref.load %arg1[%c30] : memref<106xf32, #tpu.memory_space<smem>>
    %132 = vector.broadcast %131 : f32 to vector<16x128xf32>
    %133 = arith.mulf %123, %132 : vector<16x128xf32>
    %134 = arith.addf %130, %133 : vector<16x128xf32>
    %c32 = arith.constant 32 : index
    %135 = memref.load %arg1[%c32] : memref<106xf32, #tpu.memory_space<smem>>
    %136 = vector.broadcast %135 : f32 to vector<16x128xf32>
    %137 = arith.mulf %125, %136 : vector<16x128xf32>
    %138 = arith.addf %134, %137 : vector<16x128xf32>
    %c34 = arith.constant 34 : index
    %139 = memref.load %arg1[%c34] : memref<106xf32, #tpu.memory_space<smem>>
    %140 = vector.broadcast %139 : f32 to vector<16x128xf32>
    %141 = arith.mulf %127, %140 : vector<16x128xf32>
    %142 = arith.addf %138, %141 : vector<16x128xf32>
    %c36 = arith.constant 36 : index
    %143 = memref.load %arg1[%c36] : memref<106xf32, #tpu.memory_space<smem>>
    %144 = vector.broadcast %143 : f32 to vector<16x128xf32>
    %145 = arith.addf %142, %144 : vector<16x128xf32>
    %c29 = arith.constant 29 : index
    %146 = memref.load %arg1[%c29] : memref<106xf32, #tpu.memory_space<smem>>
    %147 = vector.broadcast %146 : f32 to vector<16x128xf32>
    %148 = arith.mulf %121, %147 : vector<16x128xf32>
    %c31 = arith.constant 31 : index
    %149 = memref.load %arg1[%c31] : memref<106xf32, #tpu.memory_space<smem>>
    %150 = vector.broadcast %149 : f32 to vector<16x128xf32>
    %151 = arith.mulf %123, %150 : vector<16x128xf32>
    %152 = arith.addf %148, %151 : vector<16x128xf32>
    %c33 = arith.constant 33 : index
    %153 = memref.load %arg1[%c33] : memref<106xf32, #tpu.memory_space<smem>>
    %154 = vector.broadcast %153 : f32 to vector<16x128xf32>
    %155 = arith.mulf %125, %154 : vector<16x128xf32>
    %156 = arith.addf %152, %155 : vector<16x128xf32>
    %c35 = arith.constant 35 : index
    %157 = memref.load %arg1[%c35] : memref<106xf32, #tpu.memory_space<smem>>
    %158 = vector.broadcast %157 : f32 to vector<16x128xf32>
    %159 = arith.mulf %127, %158 : vector<16x128xf32>
    %160 = arith.addf %156, %159 : vector<16x128xf32>
    %c37 = arith.constant 37 : index
    %161 = memref.load %arg1[%c37] : memref<106xf32, #tpu.memory_space<smem>>
    %162 = vector.broadcast %161 : f32 to vector<16x128xf32>
    %163 = arith.addf %160, %162 : vector<16x128xf32>
    %c38 = arith.constant 38 : index
    %164 = memref.load %arg1[%c38] : memref<106xf32, #tpu.memory_space<smem>>
    %165 = vector.broadcast %164 : f32 to vector<16x128xf32>
    %166 = arith.mulf %121, %165 : vector<16x128xf32>
    %c40 = arith.constant 40 : index
    %167 = memref.load %arg1[%c40] : memref<106xf32, #tpu.memory_space<smem>>
    %168 = vector.broadcast %167 : f32 to vector<16x128xf32>
    %169 = arith.mulf %123, %168 : vector<16x128xf32>
    %170 = arith.addf %166, %169 : vector<16x128xf32>
    %c42 = arith.constant 42 : index
    %171 = memref.load %arg1[%c42] : memref<106xf32, #tpu.memory_space<smem>>
    %172 = vector.broadcast %171 : f32 to vector<16x128xf32>
    %173 = arith.mulf %125, %172 : vector<16x128xf32>
    %174 = arith.addf %170, %173 : vector<16x128xf32>
    %c44 = arith.constant 44 : index
    %175 = memref.load %arg1[%c44] : memref<106xf32, #tpu.memory_space<smem>>
    %176 = vector.broadcast %175 : f32 to vector<16x128xf32>
    %177 = arith.mulf %127, %176 : vector<16x128xf32>
    %178 = arith.addf %174, %177 : vector<16x128xf32>
    %c46 = arith.constant 46 : index
    %179 = memref.load %arg1[%c46] : memref<106xf32, #tpu.memory_space<smem>>
    %180 = vector.broadcast %179 : f32 to vector<16x128xf32>
    %181 = arith.addf %178, %180 : vector<16x128xf32>
    %c39 = arith.constant 39 : index
    %182 = memref.load %arg1[%c39] : memref<106xf32, #tpu.memory_space<smem>>
    %183 = vector.broadcast %182 : f32 to vector<16x128xf32>
    %184 = arith.mulf %121, %183 : vector<16x128xf32>
    %c41 = arith.constant 41 : index
    %185 = memref.load %arg1[%c41] : memref<106xf32, #tpu.memory_space<smem>>
    %186 = vector.broadcast %185 : f32 to vector<16x128xf32>
    %187 = arith.mulf %123, %186 : vector<16x128xf32>
    %188 = arith.addf %184, %187 : vector<16x128xf32>
    %c43 = arith.constant 43 : index
    %189 = memref.load %arg1[%c43] : memref<106xf32, #tpu.memory_space<smem>>
    %190 = vector.broadcast %189 : f32 to vector<16x128xf32>
    %191 = arith.mulf %125, %190 : vector<16x128xf32>
    %192 = arith.addf %188, %191 : vector<16x128xf32>
    %c45 = arith.constant 45 : index
    %193 = memref.load %arg1[%c45] : memref<106xf32, #tpu.memory_space<smem>>
    %194 = vector.broadcast %193 : f32 to vector<16x128xf32>
    %195 = arith.mulf %127, %194 : vector<16x128xf32>
    %196 = arith.addf %192, %195 : vector<16x128xf32>
    %c47 = arith.constant 47 : index
    %197 = memref.load %arg1[%c47] : memref<106xf32, #tpu.memory_space<smem>>
    %198 = vector.broadcast %197 : f32 to vector<16x128xf32>
    %199 = arith.addf %196, %198 : vector<16x128xf32>
    %200 = math.exp %181 : vector<16x128xf32>
    %201 = math.exp %199 : vector<16x128xf32>
    %202 = arith.mulf %200, %13 : vector<16x128xf32>
    %203 = arith.addf %145, %202 : vector<16x128xf32>
    %204 = arith.mulf %201, %15 : vector<16x128xf32>
    %205 = arith.addf %163, %204 : vector<16x128xf32>
    %206 = arith.mulf %200, %200 : vector<16x128xf32>
    %207 = arith.mulf %145, %145 : vector<16x128xf32>
    %208 = arith.addf %206, %207 : vector<16x128xf32>
    %209 = arith.subf %208, %181 : vector<16x128xf32>
    %cst_27 = arith.constant 5.000000e-01 : f32
    %210 = vector.broadcast %cst_27 : f32 to vector<16x128xf32>
    %211 = arith.subf %209, %210 : vector<16x128xf32>
    %212 = arith.mulf %201, %201 : vector<16x128xf32>
    %213 = arith.mulf %163, %163 : vector<16x128xf32>
    %214 = arith.addf %212, %213 : vector<16x128xf32>
    %215 = arith.subf %214, %199 : vector<16x128xf32>
    %cst_28 = arith.constant 5.000000e-01 : f32
    %216 = vector.broadcast %cst_28 : f32 to vector<16x128xf32>
    %217 = arith.subf %215, %216 : vector<16x128xf32>
    %218 = arith.addf %211, %217 : vector<16x128xf32>
    %c2048_i32 = arith.constant 2048 : i32
    %219 = arith.muli %arg0, %c2048_i32 : i32
    %220 = tpu.iota {dimensions = array<i32: 0>} : vector<16x128xi32>
    %c128_i32 = arith.constant 128 : i32
    %221 = vector.broadcast %c128_i32 : i32 to vector<16x128xi32>
    %222 = arith.muli %220, %221 : vector<16x128xi32>
    %223 = vector.broadcast %219 : i32 to vector<16x128xi32>
    %224 = arith.addi %223, %222 : vector<16x128xi32>
    %225 = tpu.iota {dimensions = array<i32: 1>} : vector<16x128xi32>
    %226 = arith.addi %224, %225 : vector<16x128xi32>
    %c0_29 = arith.constant 0 : index
    %227 = memref.load %arg2[%c0_29] : memref<1xi32, #tpu.memory_space<smem>>
    %228 = vector.broadcast %227 : i32 to vector<16x128xi32>
    %229 = arith.cmpi slt, %226, %228 : vector<16x128xi32>
    %cst_30 = arith.constant 0.000000e+00 : f32
    %230 = vector.broadcast %cst_30 : f32 to vector<16x128xf32>
    %231 = arith.select %229, %218, %230 : vector<16x128xi1>, vector<16x128xf32>
    %cst_31 = arith.constant dense<0.000000e+00> : vector<128xf32>
    %232 = vector.multi_reduction <add>, %231, %cst_31 [0] : vector<16x128xf32> to vector<128xf32>
    %233 = vector.shape_cast %232 : vector<128xf32> to vector<1x128xf32>
    %c0_32 = arith.constant 0 : index
    %c0_33 = arith.constant 0 : index
    %234 = vector.load %arg5[%c0_32, %c0_33] : memref<1x128xf32, #tpu.memory_space<vmem>>, vector<1x128xf32>
    tpu.vector_store %arg5[%c0_32, %c0_33], %233 {strides = array<i32>} : memref<1x128xf32, #tpu.memory_space<vmem>>, vector<1x128xf32>,
    %c48 = arith.constant 48 : index
    %235 = memref.load %arg1[%c48] : memref<106xf32, #tpu.memory_space<smem>>
    %236 = vector.broadcast %235 : f32 to vector<16x128xf32>
    %237 = arith.mulf %203, %236 : vector<16x128xf32>
    %c54 = arith.constant 54 : index
    %238 = memref.load %arg1[%c54] : memref<106xf32, #tpu.memory_space<smem>>
    %239 = vector.broadcast %238 : f32 to vector<16x128xf32>
    %240 = arith.mulf %205, %239 : vector<16x128xf32>
    %241 = arith.addf %237, %240 : vector<16x128xf32>
    %c60 = arith.constant 60 : index
    %242 = memref.load %arg1[%c60] : memref<106xf32, #tpu.memory_space<smem>>
    %243 = vector.broadcast %242 : f32 to vector<16x128xf32>
    %244 = arith.mulf %9, %243 : vector<16x128xf32>
    %245 = arith.addf %241, %244 : vector<16x128xf32>
    %c66 = arith.constant 66 : index
    %246 = memref.load %arg1[%c66] : memref<106xf32, #tpu.memory_space<smem>>
    %247 = vector.broadcast %246 : f32 to vector<16x128xf32>
    %248 = arith.mulf %11, %247 : vector<16x128xf32>
    %249 = arith.addf %245, %248 : vector<16x128xf32>
    %c72 = arith.constant 72 : index
    %250 = memref.load %arg1[%c72] : memref<106xf32, #tpu.memory_space<smem>>
    %251 = vector.broadcast %250 : f32 to vector<16x128xf32>
    %252 = arith.addf %249, %251 : vector<16x128xf32>
    %c49 = arith.constant 49 : index
    %253 = memref.load %arg1[%c49] : memref<106xf32, #tpu.memory_space<smem>>
    %254 = vector.broadcast %253 : f32 to vector<16x128xf32>
    %255 = arith.mulf %203, %254 : vector<16x128xf32>
    %c55 = arith.constant 55 : index
    %256 = memref.load %arg1[%c55] : memref<106xf32, #tpu.memory_space<smem>>
    %257 = vector.broadcast %256 : f32 to vector<16x128xf32>
    %258 = arith.mulf %205, %257 : vector<16x128xf32>
    %259 = arith.addf %255, %258 : vector<16x128xf32>
    %c61 = arith.constant 61 : index
    %260 = memref.load %arg1[%c61] : memref<106xf32, #tpu.memory_space<smem>>
    %261 = vector.broadcast %260 : f32 to vector<16x128xf32>
    %262 = arith.mulf %9, %261 : vector<16x128xf32>
    %263 = arith.addf %259, %262 : vector<16x128xf32>
    %c67 = arith.constant 67 : index
    %264 = memref.load %arg1[%c67] : memref<106xf32, #tpu.memory_space<smem>>
    %265 = vector.broadcast %264 : f32 to vector<16x128xf32>
    %266 = arith.mulf %11, %265 : vector<16x128xf32>
    %267 = arith.addf %263, %266 : vector<16x128xf32>
    %c73 = arith.constant 73 : index
    %268 = memref.load %arg1[%c73] : memref<106xf32, #tpu.memory_space<smem>>
    %269 = vector.broadcast %268 : f32 to vector<16x128xf32>
    %270 = arith.addf %267, %269 : vector<16x128xf32>
    %c50 = arith.constant 50 : index
    %271 = memref.load %arg1[%c50] : memref<106xf32, #tpu.memory_space<smem>>
    %272 = vector.broadcast %271 : f32 to vector<16x128xf32>
    %273 = arith.mulf %203, %272 : vector<16x128xf32>
    %c56 = arith.constant 56 : index
    %274 = memref.load %arg1[%c56] : memref<106xf32, #tpu.memory_space<smem>>
    %275 = vector.broadcast %274 : f32 to vector<16x128xf32>
    %276 = arith.mulf %205, %275 : vector<16x128xf32>
    %277 = arith.addf %273, %276 : vector<16x128xf32>
    %c62 = arith.constant 62 : index
    %278 = memref.load %arg1[%c62] : memref<106xf32, #tpu.memory_space<smem>>
    %279 = vector.broadcast %278 : f32 to vector<16x128xf32>
    %280 = arith.mulf %9, %279 : vector<16x128xf32>
    %281 = arith.addf %277, %280 : vector<16x128xf32>
    %c68 = arith.constant 68 : index
    %282 = memref.load %arg1[%c68] : memref<106xf32, #tpu.memory_space<smem>>
    %283 = vector.broadcast %282 : f32 to vector<16x128xf32>
    %284 = arith.mulf %11, %283 : vector<16x128xf32>
    %285 = arith.addf %281, %284 : vector<16x128xf32>
    %c74 = arith.constant 74 : index
    %286 = memref.load %arg1[%c74] : memref<106xf32, #tpu.memory_space<smem>>
    %287 = vector.broadcast %286 : f32 to vector<16x128xf32>
    %288 = arith.addf %285, %287 : vector<16x128xf32>
    %c51 = arith.constant 51 : index
    %289 = memref.load %arg1[%c51] : memref<106xf32, #tpu.memory_space<smem>>
    %290 = vector.broadcast %289 : f32 to vector<16x128xf32>
    %291 = arith.mulf %203, %290 : vector<16x128xf32>
    %c57 = arith.constant 57 : index
    %292 = memref.load %arg1[%c57] : memref<106xf32, #tpu.memory_space<smem>>
    %293 = vector.broadcast %292 : f32 to vector<16x128xf32>
    %294 = arith.mulf %205, %293 : vector<16x128xf32>
    %295 = arith.addf %291, %294 : vector<16x128xf32>
    %c63 = arith.constant 63 : index
    %296 = memref.load %arg1[%c63] : memref<106xf32, #tpu.memory_space<smem>>
    %297 = vector.broadcast %296 : f32 to vector<16x128xf32>
    %298 = arith.mulf %9, %297 : vector<16x128xf32>
    %299 = arith.addf %295, %298 : vector<16x128xf32>
    %c69 = arith.constant 69 : index
    %300 = memref.load %arg1[%c69] : memref<106xf32, #tpu.memory_space<smem>>
    %301 = vector.broadcast %300 : f32 to vector<16x128xf32>
    %302 = arith.mulf %11, %301 : vector<16x128xf32>
    %303 = arith.addf %299, %302 : vector<16x128xf32>
    %c75 = arith.constant 75 : index
    %304 = memref.load %arg1[%c75] : memref<106xf32, #tpu.memory_space<smem>>
    %305 = vector.broadcast %304 : f32 to vector<16x128xf32>
    %306 = arith.addf %303, %305 : vector<16x128xf32>
    %c52 = arith.constant 52 : index
    %307 = memref.load %arg1[%c52] : memref<106xf32, #tpu.memory_space<smem>>
    %308 = vector.broadcast %307 : f32 to vector<16x128xf32>
    %309 = arith.mulf %203, %308 : vector<16x128xf32>
    %c58 = arith.constant 58 : index
    %310 = memref.load %arg1[%c58] : memref<106xf32, #tpu.memory_space<smem>>
    %311 = vector.broadcast %310 : f32 to vector<16x128xf32>
    %312 = arith.mulf %205, %311 : vector<16x128xf32>
    %313 = arith.addf %309, %312 : vector<16x128xf32>
    %c64 = arith.constant 64 : index
    %314 = memref.load %arg1[%c64] : memref<106xf32, #tpu.memory_space<smem>>
    %315 = vector.broadcast %314 : f32 to vector<16x128xf32>
    %316 = arith.mulf %9, %315 : vector<16x128xf32>
    %317 = arith.addf %313, %316 : vector<16x128xf32>
    %c70 = arith.constant 70 : index
    %318 = memref.load %arg1[%c70] : memref<106xf32, #tpu.memory_space<smem>>
    %319 = vector.broadcast %318 : f32 to vector<16x128xf32>
    %320 = arith.mulf %11, %319 : vector<16x128xf32>
    %321 = arith.addf %317, %320 : vector<16x128xf32>
    %c76 = arith.constant 76 : index
    %322 = memref.load %arg1[%c76] : memref<106xf32, #tpu.memory_space<smem>>
    %323 = vector.broadcast %322 : f32 to vector<16x128xf32>
    %324 = arith.addf %321, %323 : vector<16x128xf32>
    %c53 = arith.constant 53 : index
    %325 = memref.load %arg1[%c53] : memref<106xf32, #tpu.memory_space<smem>>
    %326 = vector.broadcast %325 : f32 to vector<16x128xf32>
    %327 = arith.mulf %203, %326 : vector<16x128xf32>
    %c59 = arith.constant 59 : index
    %328 = memref.load %arg1[%c59] : memref<106xf32, #tpu.memory_space<smem>>
    %329 = vector.broadcast %328 : f32 to vector<16x128xf32>
    %330 = arith.mulf %205, %329 : vector<16x128xf32>
    %331 = arith.addf %327, %330 : vector<16x128xf32>
    %c65 = arith.constant 65 : index
    %332 = memref.load %arg1[%c65] : memref<106xf32, #tpu.memory_space<smem>>
    %333 = vector.broadcast %332 : f32 to vector<16x128xf32>
    %334 = arith.mulf %9, %333 : vector<16x128xf32>
    %335 = arith.addf %331, %334 : vector<16x128xf32>
    %c71 = arith.constant 71 : index
    %336 = memref.load %arg1[%c71] : memref<106xf32, #tpu.memory_space<smem>>
    %337 = vector.broadcast %336 : f32 to vector<16x128xf32>
    %338 = arith.mulf %11, %337 : vector<16x128xf32>
    %339 = arith.addf %335, %338 : vector<16x128xf32>
    %c77 = arith.constant 77 : index
    %340 = memref.load %arg1[%c77] : memref<106xf32, #tpu.memory_space<smem>>
    %341 = vector.broadcast %340 : f32 to vector<16x128xf32>
    %342 = arith.addf %339, %341 : vector<16x128xf32>
    %cst_34 = arith.constant 0.000000e+00 : f32
    %343 = vector.broadcast %cst_34 : f32 to vector<16x128xf32>
    %344 = arith.maximumf %252, %343 : vector<16x128xf32>
    %cst_35 = arith.constant 0.000000e+00 : f32
    %345 = vector.broadcast %cst_35 : f32 to vector<16x128xf32>
    %346 = arith.maximumf %270, %345 : vector<16x128xf32>
    %cst_36 = arith.constant 0.000000e+00 : f32
    %347 = vector.broadcast %cst_36 : f32 to vector<16x128xf32>
    %348 = arith.maximumf %288, %347 : vector<16x128xf32>
    %cst_37 = arith.constant 0.000000e+00 : f32
    %349 = vector.broadcast %cst_37 : f32 to vector<16x128xf32>
    %350 = arith.maximumf %306, %349 : vector<16x128xf32>
    %cst_38 = arith.constant 0.000000e+00 : f32
    %351 = vector.broadcast %cst_38 : f32 to vector<16x128xf32>
    %352 = arith.maximumf %324, %351 : vector<16x128xf32>
    %cst_39 = arith.constant 0.000000e+00 : f32
    %353 = vector.broadcast %cst_39 : f32 to vector<16x128xf32>
    %354 = arith.maximumf %342, %353 : vector<16x128xf32>
    %c78 = arith.constant 78 : index
    %355 = memref.load %arg1[%c78] : memref<106xf32, #tpu.memory_space<smem>>
    %356 = vector.broadcast %355 : f32 to vector<16x128xf32>
    %357 = arith.mulf %344, %356 : vector<16x128xf32>
    %c82 = arith.constant 82 : index
    %358 = memref.load %arg1[%c82] : memref<106xf32, #tpu.memory_space<smem>>
    %359 = vector.broadcast %358 : f32 to vector<16x128xf32>
    %360 = arith.mulf %346, %359 : vector<16x128xf32>
    %361 = arith.addf %357, %360 : vector<16x128xf32>
    %c86 = arith.constant 86 : index
    %362 = memref.load %arg1[%c86] : memref<106xf32, #tpu.memory_space<smem>>
    %363 = vector.broadcast %362 : f32 to vector<16x128xf32>
    %364 = arith.mulf %348, %363 : vector<16x128xf32>
    %365 = arith.addf %361, %364 : vector<16x128xf32>
    %c90 = arith.constant 90 : index
    %366 = memref.load %arg1[%c90] : memref<106xf32, #tpu.memory_space<smem>>
    %367 = vector.broadcast %366 : f32 to vector<16x128xf32>
    %368 = arith.mulf %350, %367 : vector<16x128xf32>
    %369 = arith.addf %365, %368 : vector<16x128xf32>
    %c94 = arith.constant 94 : index
    %370 = memref.load %arg1[%c94] : memref<106xf32, #tpu.memory_space<smem>>
    %371 = vector.broadcast %370 : f32 to vector<16x128xf32>
    %372 = arith.mulf %352, %371 : vector<16x128xf32>
    %373 = arith.addf %369, %372 : vector<16x128xf32>
    %c98 = arith.constant 98 : index
    %374 = memref.load %arg1[%c98] : memref<106xf32, #tpu.memory_space<smem>>
    %375 = vector.broadcast %374 : f32 to vector<16x128xf32>
    %376 = arith.mulf %354, %375 : vector<16x128xf32>
    %377 = arith.addf %373, %376 : vector<16x128xf32>
    %c102 = arith.constant 102 : index
    %378 = memref.load %arg1[%c102] : memref<106xf32, #tpu.memory_space<smem>>
    %379 = vector.broadcast %378 : f32 to vector<16x128xf32>
    %380 = arith.addf %377, %379 : vector<16x128xf32>
    %c79 = arith.constant 79 : index
    %381 = memref.load %arg1[%c79] : memref<106xf32, #tpu.memory_space<smem>>
    %382 = vector.broadcast %381 : f32 to vector<16x128xf32>
    %383 = arith.mulf %344, %382 : vector<16x128xf32>
    %c83 = arith.constant 83 : index
    %384 = memref.load %arg1[%c83] : memref<106xf32, #tpu.memory_space<smem>>
    %385 = vector.broadcast %384 : f32 to vector<16x128xf32>
    %386 = arith.mulf %346, %385 : vector<16x128xf32>
    %387 = arith.addf %383, %386 : vector<16x128xf32>
    %c87 = arith.constant 87 : index
    %388 = memref.load %arg1[%c87] : memref<106xf32, #tpu.memory_space<smem>>
    %389 = vector.broadcast %388 : f32 to vector<16x128xf32>
    %390 = arith.mulf %348, %389 : vector<16x128xf32>
    %391 = arith.addf %387, %390 : vector<16x128xf32>
    %c91 = arith.constant 91 : index
    %392 = memref.load %arg1[%c91] : memref<106xf32, #tpu.memory_space<smem>>
    %393 = vector.broadcast %392 : f32 to vector<16x128xf32>
    %394 = arith.mulf %350, %393 : vector<16x128xf32>
    %395 = arith.addf %391, %394 : vector<16x128xf32>
    %c95 = arith.constant 95 : index
    %396 = memref.load %arg1[%c95] : memref<106xf32, #tpu.memory_space<smem>>
    %397 = vector.broadcast %396 : f32 to vector<16x128xf32>
    %398 = arith.mulf %352, %397 : vector<16x128xf32>
    %399 = arith.addf %395, %398 : vector<16x128xf32>
    %c99 = arith.constant 99 : index
    %400 = memref.load %arg1[%c99] : memref<106xf32, #tpu.memory_space<smem>>
    %401 = vector.broadcast %400 : f32 to vector<16x128xf32>
    %402 = arith.mulf %354, %401 : vector<16x128xf32>
    %403 = arith.addf %399, %402 : vector<16x128xf32>
    %c103 = arith.constant 103 : index
    %404 = memref.load %arg1[%c103] : memref<106xf32, #tpu.memory_space<smem>>
    %405 = vector.broadcast %404 : f32 to vector<16x128xf32>
    %406 = arith.addf %403, %405 : vector<16x128xf32>
    %c80 = arith.constant 80 : index
    %407 = memref.load %arg1[%c80] : memref<106xf32, #tpu.memory_space<smem>>
    %408 = vector.broadcast %407 : f32 to vector<16x128xf32>
    %409 = arith.mulf %344, %408 : vector<16x128xf32>
    %c84 = arith.constant 84 : index
    %410 = memref.load %arg1[%c84] : memref<106xf32, #tpu.memory_space<smem>>
    %411 = vector.broadcast %410 : f32 to vector<16x128xf32>
    %412 = arith.mulf %346, %411 : vector<16x128xf32>
    %413 = arith.addf %409, %412 : vector<16x128xf32>
    %c88 = arith.constant 88 : index
    %414 = memref.load %arg1[%c88] : memref<106xf32, #tpu.memory_space<smem>>
    %415 = vector.broadcast %414 : f32 to vector<16x128xf32>
    %416 = arith.mulf %348, %415 : vector<16x128xf32>
    %417 = arith.addf %413, %416 : vector<16x128xf32>
    %c92 = arith.constant 92 : index
    %418 = memref.load %arg1[%c92] : memref<106xf32, #tpu.memory_space<smem>>
    %419 = vector.broadcast %418 : f32 to vector<16x128xf32>
    %420 = arith.mulf %350, %419 : vector<16x128xf32>
    %421 = arith.addf %417, %420 : vector<16x128xf32>
    %c96 = arith.constant 96 : index
    %422 = memref.load %arg1[%c96] : memref<106xf32, #tpu.memory_space<smem>>
    %423 = vector.broadcast %422 : f32 to vector<16x128xf32>
    %424 = arith.mulf %352, %423 : vector<16x128xf32>
    %425 = arith.addf %421, %424 : vector<16x128xf32>
    %c100 = arith.constant 100 : index
    %426 = memref.load %arg1[%c100] : memref<106xf32, #tpu.memory_space<smem>>
    %427 = vector.broadcast %426 : f32 to vector<16x128xf32>
    %428 = arith.mulf %354, %427 : vector<16x128xf32>
    %429 = arith.addf %425, %428 : vector<16x128xf32>
    %c104 = arith.constant 104 : index
    %430 = memref.load %arg1[%c104] : memref<106xf32, #tpu.memory_space<smem>>
    %431 = vector.broadcast %430 : f32 to vector<16x128xf32>
    %432 = arith.addf %429, %431 : vector<16x128xf32>
    %c81 = arith.constant 81 : index
    %433 = memref.load %arg1[%c81] : memref<106xf32, #tpu.memory_space<smem>>
    %434 = vector.broadcast %433 : f32 to vector<16x128xf32>
    %435 = arith.mulf %344, %434 : vector<16x128xf32>
    %c85 = arith.constant 85 : index
    %436 = memref.load %arg1[%c85] : memref<106xf32, #tpu.memory_space<smem>>
    %437 = vector.broadcast %436 : f32 to vector<16x128xf32>
    %438 = arith.mulf %346, %437 : vector<16x128xf32>
    %439 = arith.addf %435, %438 : vector<16x128xf32>
    %c89 = arith.constant 89 : index
    %440 = memref.load %arg1[%c89] : memref<106xf32, #tpu.memory_space<smem>>
    %441 = vector.broadcast %440 : f32 to vector<16x128xf32>
    %442 = arith.mulf %348, %441 : vector<16x128xf32>
    %443 = arith.addf %439, %442 : vector<16x128xf32>
    %c93 = arith.constant 93 : index
    %444 = memref.load %arg1[%c93] : memref<106xf32, #tpu.memory_space<smem>>
    %445 = vector.broadcast %444 : f32 to vector<16x128xf32>
    %446 = arith.mulf %350, %445 : vector<16x128xf32>
    %447 = arith.addf %443, %446 : vector<16x128xf32>
    %c97 = arith.constant 97 : index
    %448 = memref.load %arg1[%c97] : memref<106xf32, #tpu.memory_space<smem>>
    %449 = vector.broadcast %448 : f32 to vector<16x128xf32>
    %450 = arith.mulf %352, %449 : vector<16x128xf32>
    %451 = arith.addf %447, %450 : vector<16x128xf32>
    %c101 = arith.constant 101 : index
    %452 = memref.load %arg1[%c101] : memref<106xf32, #tpu.memory_space<smem>>
    %453 = vector.broadcast %452 : f32 to vector<16x128xf32>
    %454 = arith.mulf %354, %453 : vector<16x128xf32>
    %455 = arith.addf %451, %454 : vector<16x128xf32>
    %c105 = arith.constant 105 : index
    %456 = memref.load %arg1[%c105] : memref<106xf32, #tpu.memory_space<smem>>
    %457 = vector.broadcast %456 : f32 to vector<16x128xf32>
    %458 = arith.addf %455, %457 : vector<16x128xf32>
    %459 = arith.negf %380 : vector<16x128xf32>
    %460 = math.exp %459 : vector<16x128xf32>
    %cst_40 = arith.constant 1.000000e+00 : f32
    %461 = vector.broadcast %cst_40 : f32 to vector<16x128xf32>
    %462 = arith.addf %461, %460 : vector<16x128xf32>
    %463 = arith.divf %461, %462 : vector<16x128xf32>
    %c0_41 = arith.constant 0 : index
    %c0_42 = arith.constant 0 : index
    %c0_43 = arith.constant 0 : index
    %464 = vector.load %arg4[%c0_41, %c0_42, %c0_43] : memref<4x16x128xf32, #tpu.memory_space<vmem>>, vector<1x16x128xf32>
    %465 = vector.shape_cast %464 : vector<1x16x128xf32> to vector<16x128xf32>
    %466 = vector.shape_cast %463 : vector<16x128xf32> to vector<1x16x128xf32>
    tpu.vector_store %arg4[%c0_41, %c0_42, %c0_43], %466 {strides = array<i32>} : memref<4x16x128xf32, #tpu.memory_space<vmem>>, vector<1x16x128xf32>,
    %467 = arith.negf %406 : vector<16x128xf32>
    %468 = math.exp %467 : vector<16x128xf32>
    %cst_44 = arith.constant 1.000000e+00 : f32
    %469 = vector.broadcast %cst_44 : f32 to vector<16x128xf32>
    %470 = arith.addf %469, %468 : vector<16x128xf32>
    %471 = arith.divf %469, %470 : vector<16x128xf32>
    %c1_45 = arith.constant 1 : index
    %c0_46 = arith.constant 0 : index
    %c0_47 = arith.constant 0 : index
    %472 = vector.load %arg4[%c1_45, %c0_46, %c0_47] : memref<4x16x128xf32, #tpu.memory_space<vmem>>, vector<1x16x128xf32>
    %473 = vector.shape_cast %472 : vector<1x16x128xf32> to vector<16x128xf32>
    %474 = vector.shape_cast %471 : vector<16x128xf32> to vector<1x16x128xf32>
    tpu.vector_store %arg4[%c1_45, %c0_46, %c0_47], %474 {strides = array<i32>} : memref<4x16x128xf32, #tpu.memory_space<vmem>>, vector<1x16x128xf32>,
    %475 = arith.negf %432 : vector<16x128xf32>
    %476 = math.exp %475 : vector<16x128xf32>
    %cst_48 = arith.constant 1.000000e+00 : f32
    %477 = vector.broadcast %cst_48 : f32 to vector<16x128xf32>
    %478 = arith.addf %477, %476 : vector<16x128xf32>
    %479 = arith.divf %477, %478 : vector<16x128xf32>
    %c2_49 = arith.constant 2 : index
    %c0_50 = arith.constant 0 : index
    %c0_51 = arith.constant 0 : index
    %480 = vector.load %arg4[%c2_49, %c0_50, %c0_51] : memref<4x16x128xf32, #tpu.memory_space<vmem>>, vector<1x16x128xf32>
    %481 = vector.shape_cast %480 : vector<1x16x128xf32> to vector<16x128xf32>
    %482 = vector.shape_cast %479 : vector<16x128xf32> to vector<1x16x128xf32>
    tpu.vector_store %arg4[%c2_49, %c0_50, %c0_51], %482 {strides = array<i32>} : memref<4x16x128xf32, #tpu.memory_space<vmem>>, vector<1x16x128xf32>,
    %483 = arith.negf %458 : vector<16x128xf32>
    %484 = math.exp %483 : vector<16x128xf32>
    %cst_52 = arith.constant 1.000000e+00 : f32
    %485 = vector.broadcast %cst_52 : f32 to vector<16x128xf32>
    %486 = arith.addf %485, %484 : vector<16x128xf32>
    %487 = arith.divf %485, %486 : vector<16x128xf32>
    %c3_53 = arith.constant 3 : index
    %c0_54 = arith.constant 0 : index
    %c0_55 = arith.constant 0 : index
    %488 = vector.load %arg4[%c3_53, %c0_54, %c0_55] : memref<4x16x128xf32, #tpu.memory_space<vmem>>, vector<1x16x128xf32>
    %489 = vector.shape_cast %488 : vector<1x16x128xf32> to vector<16x128xf32>
    %490 = vector.shape_cast %487 : vector<16x128xf32> to vector<1x16x128xf32>
    tpu.vector_store %arg4[%c3_53, %c0_54, %c0_55], %490 {strides = array<i32>} : memref<4x16x128xf32, #tpu.memory_space<vmem>>, vector<1x16x128xf32>,
    return
  }
  func.func @transform_0(%arg0: i32) -> i32 {
    %c0_i32 = arith.constant 0 : i32
    %c0_i32_0 = arith.constant 0 : i32
    return %c0_i32 : i32
  }
  func.func @transform_1(%arg0: i32) -> i32 {
    %c0_i32 = arith.constant 0 : i32
    %c0_i32_0 = arith.constant 0 : i32
    return %c0_i32 : i32
  }
  func.func @transform_2(%arg0: i32) -> (i32, i32, i32) {
    %c0_i32 = arith.constant 0 : i32
    %c0_i32_0 = arith.constant 0 : i32
    %c0_i32_1 = arith.constant 0 : i32
    return %c0_i32, %arg0, %c0_i32_0 : i32, i32, i32
  }
  func.func @transform_3(%arg0: i32) -> (i32, i32, i32) {
    %c0_i32 = arith.constant 0 : i32
    %c0_i32_0 = arith.constant 0 : i32
    %c0_i32_1 = arith.constant 0 : i32
    return %c0_i32, %arg0, %c0_i32_0 : i32, i32, i32
  }
  func.func @transform_4(%arg0: i32) -> (i32, i32) {
    %c0_i32 = arith.constant 0 : i32
    %c0_i32_0 = arith.constant 0 : i32
    return %c0_i32, %arg0 : i32, i32
  }
}

</mosaic_0001>

<bundles_post_ra>
// kernel: tpu_custom_call.1
= control target key start
LH: loop header
LB: loop body
LE: loop exit
PB: predicated region body
PF: predicated region fallthrough
CT: control target
= control target key end

     0   :  { %s2550_s0 = inlined_call_operand.vmem [shape: f32[106], index: 0, kind: input, shape index: {}]   ;;  %s2551_s1 = inlined_call_operand.<no memory space> [shape: s32[1], index: 1, kind: input, shape index: {}]   ;;  %s2552_s2 = inlined_call_operand.hbm [shape: f32[8,48,128], index: 2, kind: input, shape index: {}]   ;;  %s2553_s3 = inlined_call_operand.hbm [shape: f32[4,48,128], index: 3, kind: output, shape index: {0}]   ;;  %s2554_s4 = inlined_call_operand.hbm [shape: f32[1,384], index: 4, kind: output, shape index: {1}]  }
   0x1   :  { %2562 = sst [smem:[#allocation25_spill]] %s2550_s0 }
   0x2   :  { %2563 = sst [smem:[#allocation26_spill]] %s2552_s2 }
   0x3   :  { %10 = sst [smem:[#allocation2]] %s2551_s1 }
   0x4   :  { %11 = vsyncpa [#allocation6], 0 }
   0x5   :  { %12 = vsyncpa [#allocation4], 0 }
   0x6   :  { %14 = vsyncpa [#allocation4 + $0x1], 0 }
   0x7   :  { %15 = vsyncpa [#allocation5], 0 }
   0x8   :  { %17 = vsyncpa [#allocation5 + $0x1], 0 }
   0x9   :  { %18 = vsyncpa [#allocation10], 0 }
   0xa   :  { %20 = vsyncpa [#allocation10 + $0x1], 0  ;;  %s1588_s17 = smov 0   ;;  %s1590_s18 = smov 0  }
   0xb   :  { %s1592_s19 = smov 0   ;;  %s1594_s20 = smov 0  }
   0xc LB: > { %2564 = sst [smem:[#allocation20_spill]] %s1535_s18  ;;  %s1609_s1 = sadd.s32 4294967295, %s1543_s20   ;;  %s1543_s20 = sphi %s1594_s20, %s2594_s20   ;;  %s1539_s19 = sphi %s1592_s19, %s2597_s19   ;;  %s1535_s18 = sphi %s1590_s18, %s2596_s18   ;;  %s1531_s17 = sphi %s1588_s17, %s2595_s17  }
   0xd   : > { %2565 = sst [smem:[#allocation21_spill]] %s1539_s19  ;;  %s1172_s21 = sadd.s32 4294967294, %s1543_s20  }
   0xe   : > { %s1613_s22 = sadd.s32 1, %s1543_s20   ;;  %s75_s23 = sadd.s32 1, %s1539_s19 }
   0xf   : > { %2566 = sst [smem:[#allocation22_spill]] %s1613_s22  ;;  %s72_s24 = ssub.s32 %s1543_s20, %s1613_s22 }
  0x10   : > { %p82_p0 = scmp.ne.s32.totalorder %s1539_s19, %s1535_s18  ;;  %p73_p1 = scmp.eq.s32.totalorder %s72_s24, 0 }
  0x11   : > { %p83_p2 = scmp.eq.s32.totalorder %s1543_s20, 0  ;;  %p88_p3 = scmp.ne.s32.totalorder %s1535_s18, %s1531_s17 }
  0x12   : > { %p89_p4 = scmp.eq.s32.totalorder %s1609_s1, 0  ;;  %p112_p7 = scmp.eq.s32.totalorder %s1609_s1, 2 }
  0x13   : > { %s1625_s25 = scalar_select %p73_p1, %s1539_s19, %s75_s23  }
  0x14   : > { %p1627_p5 = por %p83_p2, %p82_p0  ;;  %p1633_p6 = por %p89_p4, %p88_p3 }
  0x15   : > { %2567 = sst [smem:[#allocation23_spill]] %s1625_s25  ;;  %p118_p8 = scmp.eq.s32.totalorder %s1172_s21, 2 }
  0x16   : > { %s2569_s27 = scalar_select %p1633_p6, 1, 0 }
  0x17   : > { %p1173_p9 = scmp.ge.s32.totalorder %s1543_s20, 1  ;;  %p151_p10 = scmp.lt.s32.totalorder %s1543_s20, 4 }
  0x18   : > { %p1640_p11 = por %p112_p7, %p82_p0  ;;  %p1644_p12 = por %p118_p8, %p88_p3 }
  0x19   : > { %p1648_p13 = pnand %p1173_p9, %p151_p10  ;;  %s2574_s0 = sld [smem:[#allocation25_spill]] }
  0x1a   : > { %s2570_s28 = scalar_select %p1640_p11, 1, 0 }
  0x1b   : > { %s2571_s29 = scalar_select %p1644_p12, 1, 0 }
  0x1c   : > { %p1354_p1 = pneg %p1648_p13 }
  0x1d   : > { %2572 = sst [smem:[#allocation24_spill]] %s2571_s29 }
  0x1e   : > { %p1355_p0 = pnand %p1354_p1, %p89_p4 }
  0x1f   : > { %s164_s7 = sshll.u32 %s2574_s0, 4  ;;  %s165_s7 = int_to_ptr.vmem [resolvable:$true] %s164_s7 }
  0x20   : > { %s1454_s8 = scalar_lea.vmem %s165_s7, 16  ;;  %p1456_p3 = pneg %p1355_p0 }
  0x21   : > { %p1455_p2 = scmp.ne.s32.totalorder %s165_s7, %s1454_s8  ;;  %p1462_p12 = scmp.lt.s32.totalorder %s165_s7, %s165_s7 }
  0x22   : > { %p1463_p9 = scmp.lt.s32.totalorder %s1454_s8, %s1454_s8 }
  0x23   : > { %p1457_p7 = pnand %p1456_p3, %p1455_p2 }
  0x24   : > { %p1464_p10 = por %p1463_p9, %p1462_p12 }
  0x25   : > { %p1458_p8 = pneg %p1457_p7 }
  0x27   : > { %p1465_p11 = pnand %p1464_p10, %p1458_p8 }
  0x29   : > { %1468 = shalt.err (!%p1465_p11)
}
  0x2a   : > { %s1545_s9 = smov [#allocation3]   ;;  %p1175_p6 = scmp.ge.s32.totalorder %s1543_s20, 3 }
  0x2b   : > { %1357 = dma.vmem_to_smem (!%p1355_p0), %s165_s7, 16, %s1545_s9, [#allocation6]  }
  0x2c   : > { %174 = sbr.rel (%p1175_p6) target bundleno = 65 (0x41), region = 24 }
  0x33   : > { %s178_s10 = sand.u32 1, %s1539_s19   ;;  %s1329_s11 = sshll.u32 %s1543_s20, 8 }
  0x34   : > { %s1176_s12 = sshll.u32 %s178_s10, 7  ;;  %s2575_s2 = sld [smem:[#allocation26_spill]] }
  0x35   : > { %s1333_s16 = scalar_select %p1627_p5, [#allocation0], [#allocation15] }
  0x36   : > { %s182_s21 = scalar_lea.vmem [#allocation7], %s1176_s12  ;;  %s1546_s5 = smov 768  }
  0x37   : > { %s201_s23 = sshll.u32 %s182_s21, 4  ;;  %s193_s24 = sld [smem:[%s1333_s16]]   ;;  %s202_s23 = int_to_ptr.vmem [resolvable:$true] %s201_s23 }
  0x38   : > { %1334 = sst [smem:[#allocation12]] (%p1627_p5), %s1546_s5  ;;  %s1547_s6 = smov 256  }
  0x39   : > { %1335 = sst [smem:[#allocation12 + $0x1]] (%p1627_p5), %s1547_s6  ;;  %s1548_s7 = smov 2  }
  0x3a   : > { %s188_s15 = scalar_lea.hbm %s2575_s2, %s1329_s11  ;;  %1336 = sst [smem:[#allocation12 + $0x2]] (%p1627_p5), %s1548_s7 }
  0x3b   : > { %s1549_s8 = smov 128   ;;  %s1550_s11 = smov 8  }
  0x3c   : > { %1337 = sst [smem:[#allocation12 + $0x3]] (%p1627_p5), %s1549_s8  ;;  %s179_s13 = scalar_lea.sflag [#allocation4], %s178_s10 }
  0x3d   : > { %1338 = sst [smem:[#allocation12 + $0x4]] (%p1627_p5), %s1549_s8  ;;  %s1179_s9 = sshll.u32 %s193_s24, 26 }
  0x3e   : > { %1339 = sst [smem:[#allocation12 + $0x5]] (%p1627_p5), %s1550_s11  ;;  %s1180_s12 = sadd.s32 134217728, %s1179_s9 }
  0x3f   : > { %s1551_s14 = smov [#allocation11]  }
  0x40   : > { %1340 = dma.general (%p1627_p5), %s188_s15, 2048, %s202_s23, %s179_s13, %s1551_s14, [#allocation12], %s1180_s12, 0  }
  0x41 PF: > { %226 = sbr.rel (%p1648_p13) target bundleno = 287 (0x11f), region = 32 }
  0x48   : > { %1514 = dma.done.wait (%p89_p4), [#allocation6], 16  }
  0x49   : > { %1516 = vsyncadd (%p89_p4), [#allocation6], 4294967280  ;;  %s1688_s16 = sand.u32 1, %s1535_s18   ;;  %p2576_p5 = scmp.ne.s32.totalorder %s2569_s27, 0 }
  0x4a   : > { %s1183_s10 = sshll.u32 %s1688_s16, 7  ;;  %s233_s21 = scalar_lea.sflag [#allocation4], %s1688_s16 }
  0x4b   : > { %s1692_s26 = scalar_lea.vmem [#allocation7], %s1183_s10 }
  0x4c   : > { %1518 = dma.done.wait (%p2576_p5), %s233_s21, 2048  }
  0x4d   : > { %1520 = vsyncadd (%p2576_p5), %s233_s21, 4294965248 }
  0x4e   : > { %241 = sfence }
  0x4f   : > { %v594_v0 = vlaneseq  ;;  %s291_s30 = sld [smem:[#allocation3]]  ;;  %s1199_s15 = sld [smem:[#allocation3 + $0x4]]  ;;  %v1701_v2 = vld [vmem:[%s1692_s26] sm:$0xff]  ;;  %v1704_v3 = vld [vmem:[%s1692_s26 + $0x8] sm:$0xff]  ;;  %v1710_v4 = vld [vmem:[%s1692_s26 + $0x10] sm:$0xff] }
  0x50   : > { %s1698_s23 = sld [smem:[#allocation3 + $0x8]]  ;;  %s1706_s27 = sld [smem:[#allocation3 + $0xc]]  ;;  %v1719_v6 = vld [vmem:[%s1692_s26 + $0x18] sm:$0xff]  ;;  %v1726_v8 = vld [vmem:[%s1692_s26 + $0x20] sm:$0xff]  ;;  %v1729_v9 = vld [vmem:[%s1692_s26 + $0x28] sm:$0xff] }
  0x51   : > { %v595_v1 = vshrl.u32 %v594_v0, 7  ;;  %s1250_s24 = sshll.u32 %s1609_s1, 11  ;;  %s1712_s5 = sld [smem:[#allocation3 + $0x10]]  ;;  %v1738_v12 = vld [vmem:[%s1692_s26 + $0x30] sm:$0xff]  ;;  %v1741_v13 = vld [vmem:[%s1692_s26 + $0x38] sm:$0xff]  ;;  %v1745_v17 = vand.u32 127, %v594_v0 }
  0x52   : > { %s1714_s6 = sld [smem:[#allocation3 + $0x14]]  ;;  %s1721_s7 = sld [smem:[#allocation3 + $0x18]]  ;;  %v1735_v11 = vstv %s1250_s24  ;;  %v1756_v22 = vld [vmem:[%s1692_s26 + $0x40] sm:$0xff]  ;;  %v1759_v23 = vld [vmem:[%s1692_s26 + $0x48] sm:$0xff]  ;;  %v1768_v28 = vld [vmem:[%s1692_s26 + $0x50] sm:$0xff] }
  0x53   : > { %v1716_v5 = vadd.s32 8, %v595_v1  ;;  %s1723_s8 = sld [smem:[#allocation3 + $0x1]]  ;;  %v597_v7 = vmul.u32 128, %v595_v1  ;;  %s1731_s9 = sld [smem:[#allocation3 + $0x5]]  ;;  %v1771_v29 = vld [vmem:[%s1692_s26 + $0x58] sm:$0xff] }
  0x54   : > { %s1733_s11 = sld [smem:[#allocation3 + $0x9]]  ;;  %s1750_s12 = sld [smem:[#allocation3 + $0xd]] }
  0x55   : > { %v292_v10 = vstv %s291_s30  ;;  %v296_v16 = vstv %s1199_s15  ;;  %s1752_s13 = sld [smem:[#allocation3 + $0x11]]  ;;  %v598_v21 = vmul.u32 128, %v1716_v5  ;;  %v1765_v27 = vadd.s32 %v1735_v11, %v597_v7  ;;  %s1779_s14 = sld [smem:[#allocation3 + $0x15]] }
  0x56   : > { %v293_v14 = vmul.f32 %v292_v10, %v1701_v2  ;;  %v294_v15 = vmul.f32 %v292_v10, %v1704_v3  ;;  %v297_v18 = vmul.f32 %v1710_v4, %v296_v16  ;;  %v298_v19 = vmul.f32 %v1719_v6, %v296_v16  ;;  %s1781_s10 = sld [smem:[#allocation3 + $0x19]]  ;;  %s1789_s21 = sld [smem:[#allocation3 + $0x2]] }
  0x57   : > { %v302_v20 = vstv %s1698_s23  ;;  %v308_v26 = vstv %s1706_s27  ;;  %v314_v34 = vstv %s1712_s5  ;;  %s1791_s30 = sld [smem:[#allocation3 + $0x6]]  ;;  %s1799_s15 = sld [smem:[#allocation3 + $0xa]] }
  0x58   : > { %v303_v24 = vmul.f32 %v1726_v8, %v302_v20  ;;  %v304_v25 = vmul.f32 %v1729_v9, %v302_v20  ;;  %v299_v30 = vadd.f32 %v297_v18, %v293_v14  ;;  %v300_v31 = vadd.f32 %v298_v19, %v294_v15  ;;  %s1801_s23 = sld [smem:[#allocation3 + $0xe]]  ;;  %s1809_s27 = sld [smem:[#allocation3 + $0x12]] }
  0x59   : > { %v309_v32 = vmul.f32 %v1738_v12, %v308_v26  ;;  %v310_v33 = vmul.f32 %v1741_v13, %v308_v26  ;;  %v320_v35 = vstv %s1714_s6  ;;  %v326_v36 = vstv %s1721_s7  ;;  %s1811_s24 = sld [smem:[#allocation3 + $0x16]]  ;;  %s1821_s5 = sld [smem:[#allocation3 + $0x1a]] }
  0x5a   : > { %v330_v37 = vstv %s1723_s8  ;;  %v305_v38 = vadd.f32 %v303_v24, %v299_v30  ;;  %v306_v39 = vadd.f32 %v304_v25, %v300_v31  ;;  %v315_v40 = vmul.f32 %v1756_v22, %v314_v34  ;;  %s1823_s6 = sld [smem:[#allocation3 + $0x3]]  ;;  %s1827_s7 = sld [smem:[#allocation3 + $0x7]] }
  0x5b   : > { %v316_v41 = vmul.f32 %v1759_v23, %v314_v34  ;;  %v321_v42 = vmul.f32 %v1768_v28, %v320_v35  ;;  %v322_v43 = vmul.f32 %v1771_v29, %v320_v35  ;;  %v331_v44 = vmul.f32 %v330_v37, %v1701_v2  ;;  %s1829_s8 = sld [smem:[#allocation3 + $0xb]]  ;;  %s2067_s2 = sld [smem:[#allocation3 + $0x39]] }
  0x5c   : > { %v332_v45 = vmul.f32 %v330_v37, %v1704_v3  ;;  %v311_v46 = vadd.f32 %v309_v32, %v305_v38  ;;  %v312_v47 = vadd.f32 %v310_v33, %v306_v39  ;;  %v334_v48 = vstv %s1731_s9  ;;  %s1839_s9 = sld [smem:[#allocation3 + $0xf]]  ;;  %s2062_s0 = sld [smem:[#allocation3 + $0x33]] }
  0x5d   : > { %v340_v49 = vstv %s1733_s11  ;;  %v335_v50 = vmul.f32 %v1710_v4, %v334_v48  ;;  %v336_v51 = vmul.f32 %v1719_v6, %v334_v48  ;;  %v346_v56 = vstv %s1750_s12  ;;  %s1841_s11 = sld [smem:[#allocation3 + $0x13]]  ;;  %s1849_s12 = sld [smem:[#allocation3 + $0x17]] }
  0x5e   : > { %v341_v52 = vmul.f32 %v1726_v8, %v340_v49  ;;  %v342_v53 = vmul.f32 %v1729_v9, %v340_v49  ;;  %v317_v54 = vadd.f32 %v315_v40, %v311_v46  ;;  %v318_v55 = vadd.f32 %v316_v41, %v312_v47  ;;  %s2069_s25 = sld [smem:[#allocation3 + $0x3f]]  ;;  %s2093_s19 = sld [smem:[#allocation3 + $0x34]] }
  0x5f   : > { %v352_v57 = vstv %s1752_s13  ;;  %v337_v58 = vadd.f32 %v335_v50, %v331_v44  ;;  %v338_v59 = vadd.f32 %v336_v51, %v332_v45  ;;  %v347_v60 = vmul.f32 %v1738_v12, %v346_v56  ;;  %s1859_s13 = sld [smem:[#allocation3 + $0x1c]]  ;;  %s2099_s18 = sld [smem:[#allocation3 + $0x3a]] }
  0x60   : > { %v348_v61 = vmul.f32 %v1741_v13, %v346_v56  ;;  %v323_v62 = vadd.f32 %v321_v42, %v317_v54  ;;  %v324_v63 = vadd.f32 %v322_v43, %v318_v55  ;;  %v353_v0 = vmul.f32 %v1756_v22, %v352_v57  ;;  %s2109_s22 = sld [smem:[#allocation3 + $0x40]]  ;;  %s2111_s29 = sld [smem:[#allocation3 + $0x46]] }
  0x61   : > { %v354_v1 = vmul.f32 %v1759_v23, %v352_v57  ;;  %v343_v7 = vadd.f32 %v341_v52, %v337_v58  ;;  %v344_v10 = vadd.f32 %v342_v53, %v338_v59  ;;  %v358_v14 = vstv %s1779_s14  ;;  %s1861_s14 = sld [smem:[#allocation3 + $0x1e]] }
  0x62   : > { %v364_v15 = vstv %s1781_s10  ;;  %v1815_v16 = vadd.f32 %v326_v36, %v323_v62  ;;  %v1817_v18 = vadd.f32 %v326_v36, %v324_v63  ;;  %v359_v19 = vmul.f32 %v1768_v28, %v358_v14  ;;  %s1869_s10 = sld [smem:[#allocation3 + $0x1b]] }
  0x63   : > { %v360_v20 = vmul.f32 %v1771_v29, %v358_v14  ;;  %v349_v24 = vadd.f32 %v347_v60, %v343_v7  ;;  %v350_v25 = vadd.f32 %v348_v61, %v344_v10  ;;  %v368_v26 = vstv %s1789_s21  ;;  %s1871_s21 = sld [smem:[#allocation3 + $0x20]] }
  0x64   : > { %v372_v30 = vstv %s1791_s30  ;;  %v369_v31 = vmul.f32 %v368_v26, %v1701_v2  ;;  %v370_v32 = vmul.f32 %v368_v26, %v1704_v3  ;;  %v378_v37 = vstv %s1799_s15  ;;  %s1876_s30 = sld [smem:[#allocation3 + $0x22]]  ;;  %s1878_s15 = sld [smem:[#allocation3 + $0x1d]] }
  0x65   : > { %v373_v33 = vmul.f32 %v1710_v4, %v372_v30  ;;  %v374_v34 = vmul.f32 %v1719_v6, %v372_v30  ;;  %v355_v35 = vadd.f32 %v353_v0, %v349_v24  ;;  %v356_v36 = vadd.f32 %v354_v1, %v350_v25 }
  0x66   : > { %v384_v38 = vstv %s1801_s23  ;;  %v379_v41 = vmul.f32 %v1726_v8, %v378_v37  ;;  %v380_v42 = vmul.f32 %v1729_v9, %v378_v37  ;;  %v390_v49 = vstv %s1809_s27  ;;  %s1895_s23 = sld [smem:[#allocation3 + $0x1f]]  ;;  %s1897_s27 = sld [smem:[#allocation3 + $0x21]] }
  0x67   : > { %v375_v39 = vadd.f32 %v373_v33, %v369_v31  ;;  %v376_v40 = vadd.f32 %v374_v34, %v370_v32  ;;  %v361_v43 = vadd.f32 %v359_v19, %v355_v35  ;;  %v362_v44 = vadd.f32 %v360_v20, %v356_v36 }
  0x68   : > { %v385_v45 = vmul.f32 %v1738_v12, %v384_v38  ;;  %v386_v46 = vmul.f32 %v1741_v13, %v384_v38  ;;  %v396_v50 = vstv %s1811_s24  ;;  %v391_v53 = vmul.f32 %v1756_v22, %v390_v49  ;;  %s1909_s24 = sld [smem:[#allocation3 + $0x24]] }
  0x69   : > { %v381_v47 = vadd.f32 %v379_v41, %v375_v39  ;;  %v382_v48 = vadd.f32 %v380_v42, %v376_v40  ;;  %v365_v51 = vadd.f32 %v364_v15, %v361_v43  ;;  %v366_v52 = vadd.f32 %v364_v15, %v362_v44 }
  0x6a   : > { %v392_v54 = vmul.f32 %v1759_v23, %v390_v49  ;;  %v397_v57 = vmul.f32 %v1768_v28, %v396_v50  ;;  %v398_v58 = vmul.f32 %v1771_v29, %v396_v50  ;;  %v402_v59 = vstv %s1821_s5  ;;  %s1911_s5 = sld [smem:[#allocation3 + $0x23]] }
  0x6b   : > { %v387_v55 = vadd.f32 %v385_v45, %v381_v47  ;;  %v388_v56 = vadd.f32 %v386_v46, %v382_v48  ;;  %v406_v60 = vstv %s1823_s6  ;;  %v410_v61 = vstv %s1827_s7  ;;  %s1919_s6 = sld [smem:[#allocation3 + $0x26]]  ;;  %s1921_s7 = sld [smem:[#allocation3 + $0x28]] }
  0x6c   : > { %v416_v62 = vstv %s1829_s8  ;;  %v407_v1 = vmul.f32 %v406_v60, %v1701_v2  ;;  %v408_v7 = vmul.f32 %v406_v60, %v1704_v3  ;;  %v411_v10 = vmul.f32 %v1710_v4, %v410_v61  ;;  %s1929_s8 = sld [smem:[#allocation3 + $0x25]] }
  0x6d   : > { %v393_v63 = vadd.f32 %v391_v53, %v387_v55  ;;  %v394_v0 = vadd.f32 %v392_v54, %v388_v56  ;;  %v412_v14 = vmul.f32 %v1719_v6, %v410_v61  ;;  %v417_v15 = vmul.f32 %v1726_v8, %v416_v62 }
  0x6e   : > { %v418_v19 = vmul.f32 %v1729_v9, %v416_v62  ;;  %v422_v25 = vstv %s1839_s9  ;;  %v428_v26 = vstv %s1841_s11  ;;  %v413_v2 = vadd.f32 %v411_v10, %v407_v1  ;;  %s1933_s9 = sld [smem:[#allocation3 + $0x2a]]  ;;  %s1935_s11 = sld [smem:[#allocation3 + $0x2c]] }
  0x6f   : > { %v399_v20 = vadd.f32 %v397_v57, %v393_v63  ;;  %v400_v24 = vadd.f32 %v398_v58, %v394_v0  ;;  %v414_v3 = vadd.f32 %v412_v14, %v408_v7  ;;  %v423_v30 = vmul.f32 %v1738_v12, %v422_v25 }
  0x70   : > { %v424_v4 = vmul.f32 %v1741_v13, %v422_v25  ;;  %v429_v8 = vmul.f32 %v1756_v22, %v428_v26  ;;  %v1883_v9 = vadd.s32 %v1735_v11, %v598_v21  ;;  %v419_v32 = vadd.f32 %v417_v15, %v413_v2 }
  0x71   : > { %v403_v6 = vadd.f32 %v402_v59, %v399_v20  ;;  %v404_v31 = vadd.f32 %v402_v59, %v400_v24  ;;  %v420_v33 = vadd.f32 %v418_v19, %v414_v3  ;;  %v430_v12 = vmul.f32 %v1759_v23, %v428_v26 }
  0x72   : > { %v434_v13 = vstv %s1849_s12  ;;  %v1890_v36 = vmax.f32 %v1815_v16, 0.0  ;;  %v1893_v37 = vmax.f32 %v1817_v18, 0.0  ;;  %v425_v5 = vadd.f32 %v423_v30, %v419_v32  ;;  %s1947_s12 = sld [smem:[#allocation3 + $0x27]] }
  0x73   : > { %v435_v34 = vmul.f32 %v1768_v28, %v434_v13  ;;  %v436_v35 = vmul.f32 %v1771_v29, %v434_v13  ;;  %v426_v11 = vadd.f32 %v424_v4, %v420_v33  ;;  %v1899_v21 = vmax.f32 %v365_v51, 0.0 }
  0x74   : > { %v1901_v38 = vmax.f32 %v366_v52, 0.0  ;;  %v1903_v39 = vmax.f32 %v403_v6, 0.0  ;;  %v1905_v40 = vmax.f32 %v404_v31, 0.0  ;;  %v452_v16 = vstv %s1859_s13  ;;  %s1951_s13 = sld [smem:[#allocation3 + $0x2e]] }
  0x75   : > { %v456_v41 = vstv %s1861_s14  ;;  %v431_v18 = vadd.f32 %v429_v8, %v425_v5  ;;  %v432_v42 = vadd.f32 %v430_v12, %v426_v11  ;;  %v453_v43 = vmul.f32 %v452_v16, %v1890_v36  ;;  %s1953_s14 = sld [smem:[#allocation3 + $0x29]] }
  0x76   : > { %v454_v44 = vmul.f32 %v452_v16, %v1893_v37  ;;  %v440_v45 = vstv %s1869_s10  ;;  %v457_v46 = vmul.f32 %v456_v41, %v1899_v21  ;;  %v458_v47 = vmul.f32 %v456_v41, %v1901_v38  ;;  %s1959_s10 = sld [smem:[#allocation3 + $0x2b]] }
  0x77   : > { %v462_v48 = vstv %s1871_s21  ;;  %v437_v49 = vadd.f32 %v435_v34, %v431_v18  ;;  %v438_v50 = vadd.f32 %v436_v35, %v432_v42  ;;  %v468_v55 = vstv %s1876_s30  ;;  %s1961_s21 = sld [smem:[#allocation3 + $0x2d]]  ;;  %s1976_s30 = sld [smem:[#allocation3 + $0x2f]] }
  0x78   : > { %v463_v51 = vmul.f32 %v462_v48, %v1903_v39  ;;  %v464_v52 = vmul.f32 %v462_v48, %v1905_v40  ;;  %v459_v53 = vadd.f32 %v457_v46, %v453_v43  ;;  %v460_v54 = vadd.f32 %v458_v47, %v454_v44 }
  0x79   : > { %v478_v56 = vstv %s1878_s15  ;;  %v441_v57 = vadd.f32 %v440_v45, %v437_v49  ;;  %v442_v58 = vadd.f32 %v440_v45, %v438_v50  ;;  %v482_v63 = vstv %s1895_s23  ;;  %s1982_s15 = sld [smem:[#allocation2]]  ;;  %s1989_s23 = sld [smem:[#allocation3 + $0x30]] }
  0x7a   : > { %v479_v59 = vmul.f32 %v478_v56, %v1890_v36  ;;  %v480_v60 = vmul.f32 %v478_v56, %v1893_v37  ;;  %v465_v61 = vadd.f32 %v463_v51, %v459_v53  ;;  %v466_v62 = vadd.f32 %v464_v52, %v460_v54 }
  0x7b   : > { %v488_v0 = vstv %s1897_s27  ;;  %v1937_v1 = vmax.f32 %v441_v57, 0.0  ;;  %v1939_v7 = vmax.f32 %v442_v58, 0.0  ;;  %v483_v10 = vmul.f32 %v482_v63, %v1899_v21  ;;  %s1991_s27 = sld [smem:[#allocation3 + $0x36]] }
  0x7c   : > { %v484_v14 = vmul.f32 %v482_v63, %v1901_v38  ;;  %v474_v15 = vstv %s1909_s24  ;;  %v489_v19 = vmul.f32 %v488_v0, %v1903_v39  ;;  %v490_v20 = vmul.f32 %v488_v0, %v1905_v40  ;;  %s1995_s24 = sld [smem:[#allocation3 + $0x3c]] }
  0x7d   : > { %v494_v24 = vstv %s1911_s5  ;;  %v469_v25 = vmul.f32 %v468_v55, %v1937_v1  ;;  %v470_v26 = vmul.f32 %v468_v55, %v1939_v7  ;;  %v485_v2 = vadd.f32 %v483_v10, %v479_v59  ;;  %s2001_s5 = sld [smem:[#allocation3 + $0x42]] }
  0x7e   : > { %v486_v3 = vadd.f32 %v484_v14, %v480_v60  ;;  %v495_v30 = vmul.f32 %v494_v24, %v1937_v1  ;;  %v496_v4 = vmul.f32 %v494_v24, %v1939_v7  ;;  %v504_v6 = vstv %s1919_s6  ;;  %s2005_s6 = sld [smem:[#allocation3 + $0x48]] }
  0x7f   : > { %v508_v31 = vstv %s1921_s7  ;;  %v471_v8 = vadd.f32 %v469_v25, %v465_v61  ;;  %v472_v32 = vadd.f32 %v470_v26, %v466_v62  ;;  %v491_v33 = vadd.f32 %v489_v19, %v485_v2  ;;  %s2011_s7 = sld [smem:[#allocation3 + $0x31]] }
  0x80   : > { %v492_v12 = vadd.f32 %v490_v20, %v486_v3  ;;  %v505_v13 = vmul.f32 %v504_v6, %v1890_v36  ;;  %v506_v34 = vmul.f32 %v504_v6, %v1893_v37  ;;  %v509_v35 = vmul.f32 %v508_v31, %v1899_v21 }
  0x81   : > { %v510_v5 = vmul.f32 %v508_v31, %v1901_v38  ;;  %v1967_v11 = vadd.f32 %v474_v15, %v471_v8  ;;  %v497_v16 = vadd.f32 %v495_v30, %v491_v33  ;;  %v500_v41 = vstv %s1929_s8  ;;  %s2013_s8 = sld [smem:[#allocation3 + $0x37]] }
  0x82   : > { %v1972_v18 = vadd.s32 %v1745_v17, %v1765_v27  ;;  %v511_v42 = vadd.f32 %v509_v35, %v505_v13  ;;  %v514_v44 = vstv %s1933_s9  ;;  %v520_v45 = vstv %s1935_s11  ;;  %s2019_s9 = sld [smem:[#allocation3 + $0x3d]]  ;;  %s2021_s11 = sld [smem:[#allocation3 + $0x43]] }
  0x83   : > { %v512_v43 = vadd.f32 %v510_v5, %v506_v34  ;;  %v1978_v46 = vadd.f32 %v474_v15, %v472_v32  ;;  %v498_v47 = vadd.f32 %v496_v4, %v492_v12  ;;  %v515_v48 = vmul.f32 %v514_v44, %v1903_v39 }
  0x84   : > { %v516_v49 = vmul.f32 %v514_v44, %v1905_v40  ;;  %v1984_v27 = vadd.f32 %v500_v41, %v497_v16  ;;  %v521_v50 = vmul.f32 %v520_v45, %v1937_v1  ;;  %v522_v51 = vmul.f32 %v520_v45, %v1939_v7 }
  0x85   : > { %v530_v52 = vstv %s1947_s12  ;;  %v517_v53 = vadd.f32 %v515_v48, %v511_v42  ;;  %v526_v57 = vstv %s1951_s13  ;;  %v534_v58 = vstv %s1953_s14  ;;  %s2034_s12 = sld [smem:[#allocation3 + $0x49]]  ;;  %s2036_s13 = sld [smem:[#allocation3 + $0x32]] }
  0x86   : > { %v518_v54 = vadd.f32 %v516_v49, %v512_v43  ;;  %v531_v55 = vmul.f32 %v530_v52, %v1890_v36  ;;  %v532_v56 = vmul.f32 %v530_v52, %v1893_v37  ;;  %v540_v59 = vstv %s1959_s10  ;;  %s2040_s14 = sld [smem:[#allocation3 + $0x38]]  ;;  %s2055_s10 = sld [smem:[#allocation3 + $0x3e]] }
  0x87   : > { %v546_v60 = vstv %s1961_s21  ;;  %v523_v61 = vadd.f32 %v521_v50, %v517_v53  ;;  %v535_v63 = vmul.f32 %v534_v58, %v1899_v21  ;;  %v536_v0 = vmul.f32 %v534_v58, %v1901_v38  ;;  %s2057_s21 = sld [smem:[#allocation3 + $0x44]]  ;;  %v1196_v58 = vld [vmem:[%s1692_s26 + $0x68] sm:$0xff] }
  0x88   : > { %v524_v62 = vadd.f32 %v522_v51, %v518_v54  ;;  %v541_v36 = vmul.f32 %v540_v59, %v1903_v39  ;;  %v542_v37 = vmul.f32 %v540_v59, %v1905_v40  ;;  %v547_v10 = vmul.f32 %v546_v60, %v1937_v1 }
  0x89   : > { %v548_v14 = vmul.f32 %v546_v60, %v1939_v7  ;;  %v2015_v15 = vadd.f32 %v526_v57, %v523_v61  ;;  %v537_v19 = vadd.f32 %v535_v63, %v531_v55  ;;  %v538_v38 = vadd.f32 %v536_v0, %v532_v56 }
  0x8a   : > { %v2017_v21 = vadd.f32 %v526_v57, %v524_v62  ;;  %v2023_v39 = vadd.f32 %v500_v41, %v498_v47  ;;  %v552_v40 = vstv %s1976_s30  ;;  %v2028_v1 = vmul.f32 %v1967_v11, %v1967_v11  ;;  %s2060_s30 = sld [smem:[#allocation3 + $0x4a]]  ;;  %v1195_v57 = vld [vmem:[%s1692_s26 + $0x60] sm:$0xff] }
  0x8b   : > { %v2032_v7 = vmul.f32 %v1978_v46, %v1978_v46  ;;  %v543_v20 = vadd.f32 %v541_v36, %v537_v19  ;;  %v544_v24 = vadd.f32 %v542_v37, %v538_v38  ;;  %v555_v25 = vmul.f32 1.442695, %v2015_v15 }
  0x8c   : > { %v557_v26 = vmul.f32 1.442695, %v2017_v21  ;;  %v2044_v2 = vmul.f32 %v1984_v27, %v1984_v27  ;;  %v2048_v3 = vmul.f32 %v2023_v39, %v2023_v39  ;;  %v2052_v30 = vadd.s32 %v1745_v17, %v1883_v9 }
  0x8d   : > { %v607_v4 = vstv %s1982_s15  ;;  %v549_v6 = vadd.f32 %v547_v10, %v543_v20  ;;  %v550_v31 = vadd.f32 %v548_v14, %v544_v24  ;;  %1414 = vpow2.f32 %v555_v25  ;;  %s2320_s15 = sld [smem:[#allocation3 + $0x56]] }
  0x8e   : > { %v621_v8 = vstv %s1989_s23  ;;  %1416 = vpow2.f32 %v557_v26  ;;  %v625_v32 = vstv %s1991_s27  ;;  %v631_v33 = vstv %s1995_s24  ;;  %s2081_s24 = sld [smem:[#allocation3 + $0x45]]  ;;  %s2326_s23 = sld [smem:[#allocation3 + $0x5a]] }
  0x8f   : > { %v637_v17 = vstv %s2001_s5  ;;  %v2071_v9 = vadd.f32 %v552_v40, %v549_v6  ;;  %v2073_v12 = vadd.f32 %v552_v40, %v550_v31  ;;  %v2076_v13 = vmul.f32 %v1756_v22, %v631_v33  ;;  %s2083_s5 = sld [smem:[#allocation3 + $0x4b]]  ;;  %s2328_s27 = sld [smem:[#allocation3 + $0x5e]] }
  0x90   : > { %v2079_v34 = vmul.f32 %v1759_v23, %v631_v33  ;;  %v2086_v35 = vmul.f32 %v1768_v28, %v637_v17  ;;  %v2089_v5 = vmul.f32 %v1771_v29, %v637_v17  ;;  %v643_v16 = vstv %s2005_s6  ;;  %s2334_s6 = sld [smem:[#allocation3 + $0x62]] }
  0x91   : > { %v647_v41 = vstv %s2011_s7  ;;  %v559_v42 = vmul.f32 1.442695, %v2071_v9  ;;  %v561_v43 = vmul.f32 1.442695, %v2073_v12  ;;  %v651_v44 = vstv %s2013_s8  ;;  %s2340_s7 = sld [smem:[#allocation3 + $0x66]]  ;;  %s2342_s8 = sld [smem:[#allocation3 + $0x4f]] }
  0x92   : > { %v657_v45 = vstv %s2019_s9  ;;  %v663_v49 = vstv %s2021_s11  ;;  %v673_v53 = vstv %s2036_s13  ;;  %v677_v54 = vstv %s2040_s14  ;;  %s2352_s9 = sld [smem:[#allocation3 + $0x53]]  ;;  %s265_s11 = scalar_lea.vmem [#allocation9], %s1688_s16 }
  0x93   : > { %v2102_v47 = vmul.f32 %v1756_v22, %v657_v45  ;;  %v2105_v48 = vmul.f32 %v1759_v23, %v657_v45  ;;  %1418 = vpow2.f32 %v559_v42  ;;  %v2114_v51 = vmul.f32 %v1768_v28, %v663_v49  ;;  %s2373_s13 = sld [smem:[#allocation3 + $0x5b]]  ;;  %s2389_s14 = sld [smem:[#allocation3 + $0x5f]] }
  0x94   : > { %v2117_v52 = vmul.f32 %v1771_v29, %v663_v49  ;;  %1420 = vpow2.f32 %v561_v43  ;;  %v683_v55 = vstv %s2055_s10  ;;  %v689_v56 = vstv %s2057_s21  ;;  %s2391_s10 = sld [smem:[#allocation3 + $0x63]]  ;;  %s2401_s21 = sld [smem:[#allocation3 + $0x50]] }
  0x95   : > { %v2126_v59 = vmul.f32 %v1756_v22, %v683_v55  ;;  %v2129_v60 = vmul.f32 %v1759_v23, %v683_v55  ;;  %v2132_v61 = vmul.f32 %v1768_v28, %v689_v56  ;;  %v2135_v62 = vmul.f32 %v1771_v29, %v689_v56  ;;  %v1197_v56 = vld [vmem:[%s1692_s26 + $0x70] sm:$0xff] }
  0x96   : > { %v699_v0 = vstv %s2062_s0  ;;  %v709_v37 = vstv %s2069_s25  ;;  %v715_v38 = vstv %s2081_s24  ;;  %v725_v17 = vstv %s2093_s19  ;;  %s2245_s0 = sld [smem:[#allocation3 + $0x4c]]  ;;  %s2247_s19 = sld [smem:[#allocation3 + $0x35]] }
  0x97   : > { %v1415_v10 = vpop.eup %1414  ;;  %v2142_v14 = vmul.f32 %v1756_v22, %v709_v37  ;;  %v2145_v19 = vmul.f32 %v1759_v23, %v709_v37  ;;  %v2150_v26 = vmul.f32 %v1768_v28, %v715_v38  ;;  %v2153_v6 = vmul.f32 %v1771_v29, %v715_v38  ;;  %s2267_s25 = sld [smem:[#allocation3 + $0x41]]  ;;  %s2409_s24 = sld [smem:[#allocation3 + $0x54]] }
  0x98   : > { %v1417_v20 = vpop.eup %1416  ;;  %v563_v24 = vmul.f32 %v1415_v10, %v1195_v57  ;;  %v571_v25 = vmul.f32 %v1415_v10, %v1415_v10  ;;  %v735_v49 = vstv %s2109_s22  ;;  %v741_v55 = vstv %s2111_s29  ;;  %s2249_s22 = sld [smem:[#allocation3 + $0x3b]]  ;;  %s2298_s29 = sld [smem:[#allocation3 + $0x47]] }
  0x99   : > { %v564_v31 = vmul.f32 %v1417_v20, %v1196_v58  ;;  %v572_v33 = vmul.f32 %v1417_v20, %v1417_v20  ;;  %v2169_v37 = vmul.f32 %v1756_v22, %v735_v49  ;;  %v2172_v10 = vmul.f32 %v1759_v23, %v735_v49 }
  0x9a   : > { %v2158_v43 = vadd.f32 %v563_v24, %v1967_v11  ;;  %v575_v45 = vadd.f32 %v2028_v1, %v571_v25  ;;  %v1198_v11 = vld [vmem:[%s1692_s26 + $0x78] sm:$0xff]  ;;  %vm2187_vm0 = vcmp.lt.s32.totalorder %v1972_v18, %v607_v4  ;;  %vm2201_vm1 = vcmp.lt.s32.totalorder %v2052_v30, %v607_v4  ;;  %s2300_s26 = sld [smem:[#allocation3 + $0x4d]] }
  0x9b   : > { %v2165_v57 = vadd.f32 %v564_v31, %v1978_v46  ;;  %v576_v58 = vadd.f32 %v2032_v7, %v572_v33 }
  0x9c   : > { %v577_v1 = vsub.f32 %v575_v45, %v2015_v15  ;;  %v622_v38 = vmul.f32 %v621_v8, %v2158_v43  ;;  %v648_v20 = vmul.f32 %v647_v41, %v2158_v43  ;;  %v674_v46 = vmul.f32 %v673_v53, %v2158_v43 }
  0x9d   : > { %v1419_v24 = vpop.eup %1418  ;;  %v578_v7 = vsub.f32 %v576_v58, %v2017_v21  ;;  %v623_v15 = vmul.f32 %v621_v8, %v2165_v57  ;;  %v649_v31 = vmul.f32 %v647_v41, %v2165_v57  ;;  %v675_v33 = vmul.f32 %v673_v53, %v2165_v57 }
  0x9e   : > { %v1421_v45 = vpop.eup %1420  ;;  %v567_v49 = vmul.f32 %v1419_v24, %v1197_v56  ;;  %v1246_v40 = vadd.f32 -0.5, %v577_v1  ;;  %v581_v42 = vmul.f32 %v1419_v24, %v1419_v24  ;;  %v700_v21 = vmul.f32 %v699_v0, %v2158_v43 }
  0x9f   : > { %v568_v8 = vmul.f32 %v1421_v45, %v1198_v11  ;;  %v1247_v58 = vadd.f32 -0.5, %v578_v7  ;;  %v582_v41 = vmul.f32 %v1421_v45, %v1421_v45  ;;  %v2207_v53 = vmul.f32 %v699_v0, %v2165_v57 }
  0xa0   : > { %v2210_v56 = vadd.f32 %v567_v49, %v1984_v27  ;;  %v585_v30 = vadd.f32 %v2044_v2, %v581_v42  ;;  %v726_v4 = vmul.f32 %v725_v17, %v2158_v43  ;;  %v727_v1 = vmul.f32 %v725_v17, %v2165_v57 }
  0xa1   : > { %v2216_v24 = vadd.f32 %v568_v8, %v2023_v39  ;;  %v586_v11 = vadd.f32 %v2048_v3, %v582_v41  ;;  %v2220_v7 = vmul.f32 %v1768_v28, %v741_v55  ;;  %v2223_v0 = vmul.f32 %v1771_v29, %v741_v55 }
  0xa2   : > { %v587_v27 = vsub.f32 %v585_v30, %v2071_v9  ;;  %v626_v2 = vmul.f32 %v625_v32, %v2210_v56  ;;  %v652_v42 = vmul.f32 %v651_v44, %v2210_v56  ;;  %v678_v39 = vmul.f32 %v677_v54, %v2210_v56 }
  0xa3   : > { %v588_v17 = vsub.f32 %v586_v11, %v2073_v12  ;;  %v627_v3 = vmul.f32 %v625_v32, %v2216_v24  ;;  %v653_v55 = vmul.f32 %v651_v44, %v2216_v24  ;;  %v679_v9 = vmul.f32 %v677_v54, %v2216_v24 }
  0xa4   : > { %v1248_v45 = vadd.f32 -0.5, %v587_v27  ;;  %v628_v49 = vadd.f32 %v626_v2, %v622_v38  ;;  %v654_v8 = vadd.f32 %v652_v42, %v648_v20  ;;  %v680_v41 = vadd.f32 %v678_v39, %v674_v46 }
  0xa5   : > { %v1249_v30 = vadd.f32 -0.5, %v588_v17  ;;  %v629_v36 = vadd.f32 %v627_v3, %v623_v15  ;;  %v655_v63 = vadd.f32 %v653_v55, %v649_v31  ;;  %v681_v50 = vadd.f32 %v679_v9, %v675_v33 }
  0xa6   : > { %v591_v32 = vadd.f32 %v1248_v45, %v1246_v40  ;;  %v634_v12 = vadd.f32 %v2076_v13, %v628_v49  ;;  %v660_v44 = vadd.f32 %v2102_v47, %v654_v8  ;;  %v686_v54 = vadd.f32 %v2126_v59, %v680_v41 }
  0xa7   : > { %v592_v38 = vadd.f32 %v1249_v30, %v1247_v58  ;;  %v635_v20 = vadd.f32 %v2079_v34, %v629_v36  ;;  %v661_v46 = vadd.f32 %v2105_v48, %v655_v63  ;;  %v687_v15 = vadd.f32 %v2129_v60, %v681_v50 }
  0xa8   : > { %v610_v13 = vsel %vm2187_vm0, %v591_v32, 0.0  ;;  %v640_v47 = vadd.f32 %v2086_v35, %v634_v12  ;;  %v666_v59 = vadd.f32 %v2114_v51, %v660_v44  ;;  %v692_v40 = vadd.f32 %v2132_v61, %v686_v54 }
  0xa9   : > { %v611_v34 = vsel %vm2201_vm1, %v592_v38, 0.0  ;;  %v641_v48 = vadd.f32 %v2089_v5, %v635_v20  ;;  %v667_v50 = vadd.f32 %v2117_v52, %v661_v46  ;;  %v693_v60 = vadd.f32 %v2135_v62, %v687_v15 }
  0xaa   : > { %v612_v35 = vadd.f32 %v611_v34, %v610_v13  ;;  %v644_v51 = vadd.f32 %v643_v16, %v640_v47  ;;  %v2581_v61 = vstv %s2034_s12  ;;  %v2582_v36 = vstv %s2060_s30  ;;  %s2371_s12 = sld [smem:[#allocation3 + $0x57]] }
  0xab   : > { %v670_v63 = vadd.f32 %v2581_v61, %v666_v59  ;;  %v696_v25 = vadd.f32 %v2582_v36, %v692_v40  ;;  %v645_v31 = vadd.f32 %v643_v16, %v641_v48  ;;  %v2583_v33 = vmov %v2581_v61  ;;  %s2407_s30 = sld [smem:[#allocation3 + $0x67]] }
  0xac   : > { %v671_v5 = vadd.f32 %v2583_v33, %v667_v50  ;;  %v2584_v18 = vmov %v2582_v36  ;;  %v2585_v62 = vstv %s2067_s2  ;;  %v613_v11 = vrot.slane %v612_v35, 4  ;;  %s2313_s2 = sld [smem:[#allocation3 + $0x4e]] }
  0xad   : > { %v2281_v52 = vadd.f32 %v2584_v18, %v693_v60  ;;  %v704_v58 = vmul.f32 %v2585_v62, %v2210_v56  ;;  %v2586_v27 = vmov %v2585_v62  ;;  %v2587_v42 = vstv %s2099_s18  ;;  %s2318_s18 = sld [smem:[#allocation3 + $0x52]] }
  0xae   : > { %v705_v2 = vmul.f32 %v2586_v27, %v2216_v24  ;;  %v730_v39 = vmul.f32 %v2587_v42, %v2210_v56  ;;  %v2588_v17 = vmov %v2587_v42  ;;  %v747_v16 = vstv %s2245_s0  ;;  %s2415_s0 = sld [smem:[#allocation3 + $0x5c]] }
  0xaf   : > { %v731_v3 = vmul.f32 %v2588_v17, %v2216_v24  ;;  %v706_v55 = vadd.f32 %v704_v58, %v700_v21  ;;  %v751_v9 = vstv %s2247_s19  ;;  %v755_v45 = vstv %s2249_s22  ;;  %s2419_s19 = sld [smem:[#allocation3 + $0x60]]  ;;  %s2427_s22 = sld [smem:[#allocation3 + $0x64]] }
  0xb0   : > { %v614_v49 = vadd.f32 %v613_v11, %v612_v35  ;;  %v707_v8 = vadd.f32 %v705_v2, %v2207_v53  ;;  %v732_v41 = vadd.f32 %v730_v39, %v726_v4  ;;  %v752_v12 = vmul.f32 %v751_v9, %v2158_v43 }
  0xb1   : > { %v733_v30 = vadd.f32 %v731_v3, %v727_v1  ;;  %v712_v32 = vadd.f32 %v2142_v14, %v706_v55  ;;  %v753_v44 = vmul.f32 %v751_v9, %v2165_v57  ;;  %v756_v21 = vmul.f32 %v755_v45, %v2210_v56 }
  0xb2   : > { %v615_v54 = vrot.slane %v614_v49, 2  ;;  %v713_v38 = vadd.f32 %v2145_v19, %v707_v8  ;;  %v738_v20 = vadd.f32 %v2169_v37, %v732_v41  ;;  %v757_v4 = vmul.f32 %v755_v45, %v2216_v24 }
  0xb3   : > { %v739_v46 = vadd.f32 %v2172_v10, %v733_v30  ;;  %v718_v53 = vadd.f32 %v2150_v26, %v712_v32  ;;  %v758_v1 = vadd.f32 %v756_v21, %v752_v12  ;;  %v761_v14 = vstv %s2267_s25  ;;  %s2429_s25 = sld [smem:[#allocation3 + $0x68]] }
  0xb4   : > { %v616_v43 = vadd.f32 %v615_v54, %v614_v49  ;;  %v719_v57 = vadd.f32 %v2153_v6, %v713_v38  ;;  %v744_v56 = vadd.f32 %v2220_v7, %v738_v20  ;;  %v2589_v26 = vstv %s2083_s5  ;;  %s2413_s5 = sld [smem:[#allocation3 + $0x58]] }
  0xb5   : > { %v745_v19 = vadd.f32 %v2223_v0, %v739_v46  ;;  %v722_v37 = vadd.f32 %v2589_v26, %v718_v53  ;;  %v759_v10 = vadd.f32 %v757_v4, %v753_v44  ;;  %v762_v24 = vmul.f32 %v1756_v22, %v761_v14 }
  0xb6   : > { %v763_v15 = vmul.f32 %v1759_v23, %v761_v14  ;;  %v617_v6 = vrot.slane %v616_v43, 1  ;;  %v2590_v7 = vmov %v2589_v26  ;;  %v748_v0 = vadd.f32 %v747_v16, %v744_v56 }
  0xb7   : > { %v723_v13 = vadd.f32 %v2590_v7, %v719_v57  ;;  %v749_v47 = vadd.f32 %v747_v16, %v745_v19  ;;  %v764_v59 = vadd.f32 %v762_v24, %v758_v1  ;;  %v767_v34 = vstv %s2298_s29  ;;  %s2432_s29 = sld [smem:[#allocation3 + $0x51]] }
  0xb8   : > { %v765_v40 = vadd.f32 %v763_v15, %v759_v10  ;;  %v773_v48 = vstv %s2300_s26  ;;  %v618_v22 = vadd.f32 %v617_v6, %v616_v43  ;;  %v768_v23 = vmul.f32 %v1768_v28, %v767_v34  ;;  %s2434_s26 = sld [smem:[#allocation3 + $0x55]] }
  0xb9   : > { %v769_v50 = vmul.f32 %v1771_v29, %v767_v34  ;;  %v2338_v60 = vmax.f32 %v644_v51, 0.0  ;;  %v2344_v35 = vmax.f32 %v645_v31, 0.0  ;;  %v2346_v61 = vmax.f32 %v670_v63, 0.0 }
  0xba   : > { %v2348_v36 = vmax.f32 %v671_v5, 0.0  ;;  %v2350_v33 = vmax.f32 %v696_v25, 0.0  ;;  %619 = vst [vmem:[%s265_s11] sm:$0x1] %v618_v22  ;;  %v770_v28 = vadd.f32 %v768_v23, %v764_v59  ;;  %v2358_v51 = vmax.f32 %v2281_v52, 0.0 }
  0xbb   : > { %v771_v29 = vadd.f32 %v769_v50, %v765_v40  ;;  %v2360_v63 = vmax.f32 %v722_v37, 0.0  ;;  %v2362_v31 = vmax.f32 %v723_v13, 0.0  ;;  %v2364_v25 = vmax.f32 %v748_v0, 0.0 }
  0xbc   : > { %v2366_v5 = vmax.f32 %v749_v47, 0.0  ;;  %v789_v18 = vstv %s2313_s2  ;;  %v774_v62 = vadd.f32 %v773_v48, %v770_v28  ;;  %v793_v52 = vstv %s2318_s18  ;;  %s2442_s2 = sld [smem:[#allocation3 + $0x59]]  ;;  %s2444_s18 = sld [smem:[#allocation3 + $0x5d]] }
  0xbd   : > { %v775_v58 = vadd.f32 %v773_v48, %v771_v29  ;;  %v790_v11 = vmul.f32 %v789_v18, %v2338_v60  ;;  %v791_v27 = vmul.f32 %v789_v18, %v2344_v35  ;;  %v799_v2 = vstv %s2320_s15  ;;  %s2458_s15 = sld [smem:[#allocation3 + $0x61]] }
  0xbe   : > { %v805_v42 = vstv %s2326_s23  ;;  %v811_v39 = vstv %s2328_s27  ;;  %v2379_v17 = vmax.f32 %v774_v62, 0.0  ;;  %v794_v55 = vmul.f32 %v793_v52, %v2346_v61  ;;  %s2460_s23 = sld [smem:[#allocation3 + $0x65]]  ;;  %s2481_s27 = sld [smem:[#allocation3 + $0x69]] }
  0xbf   : > { %v2381_v3 = vmax.f32 %v775_v58, 0.0  ;;  %v795_v16 = vmul.f32 %v793_v52, %v2348_v36  ;;  %v800_v9 = vmul.f32 %v799_v2, %v2350_v33  ;;  %v801_v45 = vmul.f32 %v799_v2, %v2358_v51 }
  0xc0   : > { %v806_v49 = vmul.f32 %v805_v42, %v2360_v63  ;;  %v807_v8 = vmul.f32 %v805_v42, %v2362_v31  ;;  %v796_v41 = vadd.f32 %v794_v55, %v790_v11  ;;  %v812_v32 = vmul.f32 %v811_v39, %v2364_v25 }
  0xc1   : > { %v797_v30 = vadd.f32 %v795_v16, %v791_v27  ;;  %v813_v12 = vmul.f32 %v811_v39, %v2366_v5  ;;  %v817_v44 = vstv %s2334_s6  ;;  %v823_v21 = vstv %s2340_s7  ;;  %s1184_s6 = sshll.u32 %s1688_s16, 6 }
  0xc2   : > { %v827_v54 = vstv %s2342_s8  ;;  %v831_v38 = vstv %s2352_s9  ;;  %v802_v20 = vadd.f32 %v800_v9, %v796_v41  ;;  %v818_v53 = vmul.f32 %v817_v44, %v2379_v17  ;;  %s259_s7 = scalar_lea.vmem [#allocation8], %s1184_s6  ;;  %s1000_s8 = scalar_lea.sflag [#allocation5], %s1688_s16 }
  0xc3   : > { %v803_v46 = vadd.f32 %v801_v45, %v797_v30  ;;  %v819_v4 = vmul.f32 %v817_v44, %v2381_v3  ;;  %v828_v1 = vmul.f32 %v827_v54, %v2338_v60  ;;  %v829_v14 = vmul.f32 %v827_v54, %v2344_v35  ;;  %s1005_s9 = scalar_lea.sflag [#allocation10], %s1688_s16 }
  0xc4   : > { %v832_v43 = vmul.f32 %v831_v38, %v2346_v61  ;;  %v833_v57 = vmul.f32 %v831_v38, %v2348_v36  ;;  %v808_v56 = vadd.f32 %v806_v49, %v802_v20  ;;  %v837_v26 = vstv %s2371_s12 }
  0xc5   : > { %v809_v19 = vadd.f32 %v807_v8, %v803_v46  ;;  %v843_v37 = vstv %s2373_s13  ;;  %v838_v15 = vmul.f32 %v837_v26, %v2350_v33  ;;  %v839_v6 = vmul.f32 %v837_v26, %v2358_v51 }
  0xc6   : > { %v834_v10 = vadd.f32 %v832_v43, %v828_v1  ;;  %v835_v24 = vadd.f32 %v833_v57, %v829_v14  ;;  %v814_v7 = vadd.f32 %v812_v32, %v808_v56  ;;  %v844_v0 = vmul.f32 %v843_v37, %v2360_v63 }
  0xc7   : > { %v815_v13 = vadd.f32 %v813_v12, %v809_v19  ;;  %v845_v47 = vmul.f32 %v843_v37, %v2362_v31  ;;  %v849_v34 = vstv %s2389_s14  ;;  %v855_v48 = vstv %s2391_s10 }
  0xc8   : > { %v840_v59 = vadd.f32 %v838_v15, %v834_v10  ;;  %v841_v40 = vadd.f32 %v839_v6, %v835_v24  ;;  %v820_v22 = vadd.f32 %v818_v53, %v814_v7  ;;  %v850_v50 = vmul.f32 %v849_v34, %v2364_v25 }
  0xc9   : > { %v821_v23 = vadd.f32 %v819_v4, %v815_v13  ;;  %v851_v28 = vmul.f32 %v849_v34, %v2366_v5  ;;  %v856_v62 = vmul.f32 %v855_v48, %v2379_v17  ;;  %v857_v27 = vmul.f32 %v855_v48, %v2381_v3 }
  0xca   : > { %v846_v29 = vadd.f32 %v844_v0, %v840_v59  ;;  %v847_v18 = vadd.f32 %v845_v47, %v841_v40  ;;  %v2436_v58 = vadd.f32 %v823_v21, %v820_v22  ;;  %v865_v52 = vstv %s2401_s21 }
  0xcb   : > { %v2438_v11 = vadd.f32 %v823_v21, %v821_v23  ;;  %v866_v39 = vmul.f32 %v865_v52, %v2338_v60  ;;  %v867_v55 = vmul.f32 %v865_v52, %v2344_v35  ;;  %v861_v16 = vstv %s2407_s30 }
  0xcc   : > { %v852_v2 = vadd.f32 %v850_v50, %v846_v29  ;;  %v853_v42 = vadd.f32 %v851_v28, %v847_v18  ;;  %v869_v9 = vstv %s2409_s24  ;;  %v875_v45 = vstv %s2413_s5 }
  0xcd   : > { %v881_v49 = vstv %s2415_s0  ;;  %v870_v41 = vmul.f32 %v869_v9, %v2346_v61  ;;  %v871_v30 = vmul.f32 %v869_v9, %v2348_v36  ;;  %v887_v32 = vstv %s2419_s19 }
  0xce   : > { %v858_v8 = vadd.f32 %v856_v62, %v852_v2  ;;  %v859_v12 = vadd.f32 %v857_v27, %v853_v42  ;;  %v876_v44 = vmul.f32 %v875_v45, %v2350_v33  ;;  %v877_v21 = vmul.f32 %v875_v45, %v2358_v51 }
  0xcf   : > { %v882_v54 = vmul.f32 %v881_v49, %v2360_v63  ;;  %v872_v20 = vadd.f32 %v870_v41, %v866_v39  ;;  %v873_v46 = vadd.f32 %v871_v30, %v867_v55  ;;  %v883_v53 = vmul.f32 %v881_v49, %v2362_v31 }
  0xd0   : > { %v862_v38 = vadd.f32 %v861_v16, %v858_v8  ;;  %v888_v4 = vmul.f32 %v887_v32, %v2364_v25  ;;  %v889_v1 = vmul.f32 %v887_v32, %v2366_v5  ;;  %v893_v14 = vstv %s2427_s22 }
  0xd1   : > { %v899_v43 = vstv %s2429_s25  ;;  %v878_v57 = vadd.f32 %v876_v44, %v872_v20  ;;  %v879_v56 = vadd.f32 %v877_v21, %v873_v46  ;;  %v894_v19 = vmul.f32 %v893_v14, %v2379_v17 }
  0xd2   : > { %v895_v26 = vmul.f32 %v893_v14, %v2381_v3  ;;  %v903_v37 = vstv %s2432_s29  ;;  %v907_v10 = vstv %s2434_s26  ;;  %v913_v24 = vstv %s2442_s2 }
  0xd3   : > { %v919_v15 = vstv %s2444_s18  ;;  %v884_v6 = vadd.f32 %v882_v54, %v878_v57  ;;  %v885_v7 = vadd.f32 %v883_v53, %v879_v56  ;;  %v904_v13 = vmul.f32 %v903_v37, %v2338_v60 }
  0xd4   : > { %v905_v0 = vmul.f32 %v903_v37, %v2344_v35  ;;  %v908_v47 = vmul.f32 %v907_v10, %v2346_v61  ;;  %v909_v59 = vmul.f32 %v907_v10, %v2348_v36  ;;  %v914_v40 = vmul.f32 %v913_v24, %v2350_v33 }
  0xd5   : > { %v915_v34 = vmul.f32 %v913_v24, %v2358_v51  ;;  %v890_v48 = vadd.f32 %v888_v4, %v884_v6  ;;  %v891_v22 = vadd.f32 %v889_v1, %v885_v7  ;;  %v920_v23 = vmul.f32 %v919_v15, %v2360_v63 }
  0xd6   : > { %v921_v50 = vmul.f32 %v919_v15, %v2362_v31  ;;  %v910_v28 = vadd.f32 %v908_v47, %v904_v13  ;;  %v911_v60 = vadd.f32 %v909_v59, %v905_v0  ;;  %v925_v29 = vstv %s2458_s15 }
  0xd7   : > { %v931_v35 = vstv %s2460_s23  ;;  %v863_v18 = vadd.f32 %v861_v16, %v859_v12  ;;  %v896_v61 = vadd.f32 %v894_v19, %v890_v48  ;;  %v897_v62 = vadd.f32 %v895_v26, %v891_v22 }
  0xd8   : > { %v926_v36 = vmul.f32 %v925_v29, %v2364_v25  ;;  %v916_v33 = vadd.f32 %v914_v40, %v910_v28  ;;  %v917_v27 = vadd.f32 %v915_v34, %v911_v60  ;;  %v927_v51 = vmul.f32 %v925_v29, %v2366_v5 }
  0xd9   : > { %v932_v52 = vmul.f32 %v931_v35, %v2379_v17  ;;  %v900_v63 = vadd.f32 %v899_v43, %v896_v61  ;;  %v901_v31 = vadd.f32 %v899_v43, %v897_v62  ;;  %v933_v2 = vmul.f32 %v931_v35, %v2381_v3 }
  0xda   : > { %v1309_v42 = vmul.f32 -1.442695, %v2436_v58  ;;  %v922_v39 = vadd.f32 %v920_v23, %v916_v33  ;;  %v923_v55 = vadd.f32 %v921_v50, %v917_v27  ;;  %v1310_v16 = vmul.f32 -1.442695, %v2438_v11 }
  0xdb   : > { %v1311_v9 = vmul.f32 -1.442695, %v862_v38  ;;  %v1312_v25 = vmul.f32 -1.442695, %v863_v18  ;;  %v1315_v45 = vmul.f32 -1.442695, %v900_v63  ;;  %v937_v17 = vstv %s2481_s27 }
  0xdc   : > { %1422 = vpow2.f32 %v1309_v42  ;;  %v928_v49 = vadd.f32 %v926_v36, %v922_v39  ;;  %v929_v8 = vadd.f32 %v927_v51, %v923_v55  ;;  %v1316_v5 = vmul.f32 -1.442695, %v901_v31 }
  0xdd   : > { %1424 = vpow2.f32 %v1310_v16 }
  0xde   : > { %1426 = vpow2.f32 %v1311_v9  ;;  %v934_v41 = vadd.f32 %v932_v52, %v928_v49  ;;  %v935_v30 = vadd.f32 %v933_v2, %v929_v8 }
  0xdf   : > { %1428 = vpow2.f32 %v1312_v25 }
  0xe0   : > { %1430 = vpow2.f32 %v1315_v45  ;;  %v938_v3 = vadd.f32 %v937_v17, %v934_v41  ;;  %v939_v58 = vadd.f32 %v937_v17, %v935_v30 }
  0xe1   : > { %1432 = vpow2.f32 %v1316_v5 }
  0xe2   : > { %v1319_v32 = vmul.f32 -1.442695, %v938_v3  ;;  %v1320_v12 = vmul.f32 -1.442695, %v939_v58 }
  0xe4   : > { %1434 = vpow2.f32 %v1319_v32 }
  0xe5   : > { %1436 = vpow2.f32 %v1320_v12 }
  0xe6   : > { %v1423_v11 = vpop.eup %1422 }
  0xe7   : > { %v1425_v44 = vpop.eup %1424  ;;  %v946_v21 = vadd.f32 1.0, %v1423_v11 }
  0xe8   : > { %v1427_v54 = vpop.eup %1426  ;;  %v947_v38 = vadd.f32 1.0, %v1425_v44 }
  0xe9   : > { %v1429_v20 = vpop.eup %1428  ;;  %1438 = vrcp.f32 %v946_v21  ;;  %v960_v46 = vadd.f32 1.0, %v1427_v54 }
  0xea   : > { %v1431_v53 = vpop.eup %1430  ;;  %1440 = vrcp.f32 %v947_v38  ;;  %v961_v4 = vadd.f32 1.0, %v1429_v20 }
  0xeb   : > { %v1433_v1 = vpop.eup %1432  ;;  %1442 = vrcp.f32 %v960_v46  ;;  %v975_v14 = vadd.f32 1.0, %v1431_v53 }
  0xec   : > { %1444 = vrcp.f32 %v961_v4  ;;  %v976_v43 = vadd.f32 1.0, %v1433_v1 }
  0xed   : > { %1446 = vrcp.f32 %v975_v14 }
  0xee   : > { %1448 = vrcp.f32 %v976_v43  ;;  %v1435_v57 = vpop.eup %1434 }
  0xef   : > { %v1437_v56 = vpop.eup %1436  ;;  %v990_v19 = vadd.f32 1.0, %v1435_v57 }
  0xf0   : > { %v991_v26 = vadd.f32 1.0, %v1437_v56 }
  0xf1   : > { %1450 = vrcp.f32 %v990_v19 }
  0xf2   : > { %1452 = vrcp.f32 %v991_v26 }
  0xf3   : > { %v1439_v37 = vpop.eup %1438 }
  0xf4   : > { %v1441_v10 = vpop.eup %1440  ;;  %952 = vst [vmem:[%s259_s7] sm:$0xff] %v1439_v37 }
  0xf5   : > { %v1443_v24 = vpop.eup %1442  ;;  %953 = vst [vmem:[%s259_s7 + $0x8] sm:$0xff] %v1441_v10 }
  0xf6   : > { %v1445_v15 = vpop.eup %1444  ;;  %1313 = vst [vmem:[%s259_s7 + $0x10] sm:$0xff] %v1443_v24 }
  0xf7   : > { %v1447_v6 = vpop.eup %1446  ;;  %1314 = vst [vmem:[%s259_s7 + $0x18] sm:$0xff] %v1445_v15 }
  0xf8   : > { %v1449_v7 = vpop.eup %1448  ;;  %1317 = vst [vmem:[%s259_s7 + $0x20] sm:$0xff] %v1447_v6 }
  0xf9   : > { %1318 = vst [vmem:[%s259_s7 + $0x28] sm:$0xff] %v1449_v7 }
  0xfb   : > { %v1451_v13 = vpop.eup %1450 }
  0xfc   : > { %v1453_v0 = vpop.eup %1452  ;;  %1321 = vst [vmem:[%s259_s7 + $0x30] sm:$0xff] %v1451_v13 }
  0xfd   : > { %1322 = vst [vmem:[%s259_s7 + $0x38] sm:$0xff] %v1453_v0 }
  0xfe   : > { %s1330_s12 = sshll.u32 %s1609_s1, 8  ;;  %s1033_s13 = sshll.u32 %s259_s7, 4  ;;  %s1034_s13 = int_to_ptr.vmem [resolvable:$true] %s1033_s13 }
  0xff   : > { %s1016_s21 = scalar_lea.hbm %s2553_s3, %s1330_s12  ;;  %s1552_s30 = smov 256  }
 0x100   : > { %p2591_p4 = scmp.ne.s32.totalorder %s2570_s28, 0  ;;  %s1553_s24 = smov 768  }
 0x101   : > { %s1554_s5 = smov 2   ;;  %s1555_s0 = smov 128  }
 0x102   : > { %1344 = sst [smem:[#allocation14]] (%p2591_p4), %s1552_s30  ;;  %s1556_s19 = smov 8  }
 0x103   : > { %1345 = sst [smem:[#allocation14 + $0x1]] (%p2591_p4), %s1553_s24  ;;  %s1557_s22 = smov [#allocation13]  }
 0x104   : > { %1346 = sst [smem:[#allocation14 + $0x2]] (%p2591_p4), %s1554_s5  ;;  %s1558_s25 = smov 0  }
 0x105   : > { %1347 = sst [smem:[#allocation14 + $0x3]] (%p2591_p4), %s1555_s0  ;;  %s1326_s29 = sshll.u32 %s1609_s1, 4 }
 0x106   : > { %1348 = sst [smem:[#allocation14 + $0x4]] (%p2591_p4), %s1555_s0  ;;  %s1062_s26 = sshll.u32 %s265_s11, 4  ;;  %s1063_s26 = int_to_ptr.vmem [resolvable:$true] %s1062_s26 }
 0x107   : > { %1349 = sst [smem:[#allocation14 + $0x5]] (%p2591_p4), %s1556_s19  ;;  %s1060_s15 = scalar_lea.hbm %s2554_s4, %s1326_s29 }
 0x108   : > { %1350 = dma.general (%p2591_p4), %s1034_s13, 1024, %s1016_s21, %s1000_s8, %s1557_s22, [#allocation14], %s1558_s25, 0  }
 0x109   : > { %s1469_s23 = scalar_lea.vmem %s1063_s26, 16  ;;  %s1559_s27 = smov [#allocation9]  }
 0x10a   : > { %p1470_p6 = scmp.ne.s32.totalorder %s1063_s26, %s1469_s23  ;;  %s1473_s6 = sshll.u32 %s1559_s27, 4  ;;  %s1474_s6 = int_to_ptr.vmem [resolvable:$false] %s1473_s6 }
 0x10b   : > { %s1475_s7 = scalar_lea.vmem %s1474_s6, 32  ;;  %p1476_p13 = scmp.lt.s32.totalorder %s1063_s26, %s1474_s6 }
 0x10c   : > { %p1471_p11 = pnand %p1470_p6, %p2591_p4  ;;  %p1477_p1 = scmp.lt.s32.totalorder %s1475_s7, %s1469_s23 }
 0x10e   : > { %p1472_p12 = pneg %p1471_p11  ;;  %p1478_p0 = por %p1477_p1, %p1476_p13 }
 0x110   : > { %p1479_p2 = pnand %p1478_p0, %p1472_p12 }
 0x112   : > { %1482 = shalt.err (!%p1479_p2)
}
 0x113   : > { %s1483_s1 = scalar_lea.hbm %s1060_s15, 16  ;;  %s1487_s12 = scalar_lea.hbm %s2554_s4, 48 }
 0x114   : > { %p1484_p3 = scmp.ne.s32.totalorder %s1060_s15, %s1483_s1  ;;  %p1488_p9 = scmp.lt.u32.totalorder %s1060_s15, %s2554_s4 }
 0x115   : > { %p1489_p10 = scmp.lt.u32.totalorder %s1487_s12, %s1483_s1  ;;  %p1491_p6 = scmp.lt.u32.totalorder %s1483_s1, %s1060_s15 }
 0x116   : > { %p1485_p7 = pnand %p1484_p3, %p2591_p4 }
 0x117   : > { %p1490_p5 = por %p1489_p10, %p1488_p9 }
 0x118   : > { %p1486_p8 = pneg %p1485_p7 }
 0x119   : > { %p1492_p11 = por %p1491_p6, %p1490_p5 }
 0x11b   : > { %p1493_p12 = pnand %p1492_p11, %p1486_p8 }
 0x11d   : > { %1496 = shalt.err (!%p1493_p12)
}
 0x11e   : > { %1351 = dma.vmem_to_hbm [thread:$0]  (%p2591_p4), %s1063_s26, 16, %s1060_s15, %s1005_s9  }
 0x11f PF: > { %s2592_s10 = sld [smem:[#allocation24_spill]]  ;;  %p1367_p13 = scmp.ge.s32.totalorder %s1543_s20, 2 }
 0x120   : > { %s1074_s21 = sand.u32 1, %s1531_s17  }
 0x121   : > { %s1075_s30 = scalar_lea.sflag [#allocation5], %s1074_s21 }
 0x125   : > { %p2593_p1 = scmp.ne.s32.totalorder %s2592_s10, 0 }
 0x127   : > { %p1359_p0 = pnand %p1367_p13, %p2593_p1 }
 0x129   : > { %1522 = dma.done.wait (!%p1359_p0), %s1075_s30, 1024  }
 0x12a   : > { %1524 = vsyncadd (!%p1359_p0), %s1075_s30, 4294966272  ;;  %s1084_s24 = scalar_lea.sflag [#allocation10], %s1074_s21 }
 0x12b   : > { %1526 = dma.done.wait (!%p1359_p0), %s1084_s24, 16  }
 0x12c   : > { %1528 = vsyncadd (!%p1359_p0), %s1084_s24, 4294967280  ;;  %s2594_s20 = sld [smem:[#allocation22_spill]]  ;;  %s2595_s17 = sld [smem:[#allocation20_spill]] }
 0x12d   : > { %s2596_s18 = sld [smem:[#allocation21_spill]]  ;;  %s2597_s19 = sld [smem:[#allocation23_spill]] }
 0x132   : > { %p23_p4 = scmp.ge.s32.totalorder %s2594_s20, 5  }
 0x134   :  { %25 = sbr.rel (!%p23_p4) target bundleno = 12 (0xc), region = 119 }
 0x13b   :  { %1088 = vsyncpa [#allocation4], 1 }
 0x13c   :  { %1090 = vsyncpa [#allocation4 + $0x1], 1 }
 0x13d   :  { %1091 = vsyncpa [#allocation5], 1 }
 0x13e   :  { %1093 = vsyncpa [#allocation5 + $0x1], 1 }
 0x13f   :  { %1094 = vsyncpa [#allocation10], 1 }
 0x140   :  { %1096 = vsyncpa [#allocation10 + $0x1], 1 }
 0x141   :  { %1097 = vsyncpa [#allocation6], 1 }
 0x142   :  { %1099 = vsyncpa [#allocation6 + $0x1], 1 }

</bundles_post_ra>
